<compile_context>
chip_gen: v6e
topology: v6e:2x2x1
jax: 0.10.0
libtpu: 0.0.40
codegen_flags: <defaults>
</compile_context>

<pallas_src>
import functools

import jax
import jax.numpy as jnp
from jax.experimental import pallas as pl
from jax.experimental.pallas import tpu as pltpu


# --------------------------------------------------------------------------
# Tile-size helper
# --------------------------------------------------------------------------
def _divisor_tile(n, cap, align):
    """Largest d dividing n with d <= cap and (d % align == 0 or d == n)."""
    for d in range(min(cap, n), 0, -1):
        if n % d == 0 and (d % align == 0 or d == n):
            return d
    return n


# --------------------------------------------------------------------------
# Kernel 1: hoisted bidirectional input projection  x @ W_ih^T + (b_ih + b_hh)
# --------------------------------------------------------------------------
def _proj_kernel(*refs):
    """refs = x_part_refs..., w_part_refs..., bias_ref, out_ref.

    x part : (tr, I)            layer-1 rows, or (1, tr, I) stacked-hidden rows
    w part : (1, I, 4H)         per-direction weight (direction picked by grid)
    bias   : (1, 1, 4H)
    out    : (1, tr, 4H)
    """
    n_parts = (len(refs) - 2) // 2
    x_refs = refs[:n_parts]
    w_refs = refs[n_parts:2 * n_parts]
    b_ref, o_ref = refs[2 * n_parts], refs[2 * n_parts + 1]

    acc = b_ref[0]                                        # (1, 4H)
    for xr, wr in zip(x_refs, w_refs):
        x = xr[0] if len(xr.shape) == 3 else xr[...]      # (tr, I_part)
        acc = acc + jnp.dot(x, wr[0], preferred_element_type=jnp.float32)
    o_ref[0] = acc                                        # (tr, 4H)


def bilstm_input_proj(x_in, w_parts, bias, T, Bsz):
    """x_in: (T*B, F) layer-1 rows OR (2, T*B, H) stacked hidden from prev layer.

    w_parts: tuple of (2, I_part, 4H) per-direction weights (one part for the
             first layer, fwd/bwd halves of W_ih for deeper layers).
    bias   : (2, 1, 4H)   (b_ih + b_hh per direction)
    returns (2, T*B, 4H)  -- x-projection incl. bias for both directions.
    """
    n_parts = len(w_parts)
    N = T * Bsz
    G = w_parts[0].shape[-1]                              # 4H
    tr = _divisor_tile(N, 256, 8)
    nR = N // tr

    x_args, x_specs = [], []
    if n_parts == 1:
        x_args.append(x_in)
        x_specs.append(pl.BlockSpec((tr, x_in.shape[-1]), lambda d, r: (r, 0)))
    else:
        for p in range(n_parts):
            x_args.append(x_in)
            x_specs.append(
                pl.BlockSpec((1, tr, x_in.shape[-1]),
                             lambda d, r, p=p: (p, r, 0)))
    w_specs = [pl.BlockSpec((1, wp.shape[1], G), lambda d, r: (d, 0, 0))
               for wp in w_parts]
    b_spec = pl.BlockSpec((1, 1, G), lambda d, r: (d, 0, 0))

    return pl.pallas_call(
        _proj_kernel,
        out_shape=jax.ShapeDtypeStruct((2, N, G), jnp.float32),
        grid_spec=pltpu.PrefetchScalarGridSpec(
            num_scalar_prefetch=0,
            grid=(2, nR),
            in_specs=x_specs + w_specs + [b_spec],
            out_specs=pl.BlockSpec((1, tr, G), lambda d, r: (d, r, 0)),
        ),
        compiler_params=pltpu.CompilerParams(
            dimension_semantics=("parallel", "parallel")),
    )(*x_args, *w_parts, bias)


# --------------------------------------------------------------------------
# Kernel 2: fused fwd+bwd LSTM recurrence (x-projection precomputed)
# --------------------------------------------------------------------------
def _bilstm_rec_kernel(xp_ref, whh_ref, h_out_ref, h_st, c_st, *, Tb, H):
    """Grid = (direction, time-block).  Direction is "parallel", time "arbitrary".

    xp_ref    : (1, Tb, B, 4H)  precomputed x @ W_ih + bias for this direction
    whh_ref   : (1, H, 4H)      W_hh^T for this direction
    h_out_ref : (1, Tb, B, H)
    h_st,c_st : (B, H)          VMEM scratch carried across time blocks
    """
    d = pl.program_id(0)

    @pl.when(pl.program_id(1) == 0)
    def _():
        h_st[...] = jnp.zeros_like(h_st)
        c_st[...] = jnp.zeros_like(c_st)

    whh = whh_ref[0]                                      # (H, 4H)

    def step(s, carry):
        h_prev, c_prev = carry
        # Within-block time reversal for the backward direction (block order is
        # reversed in the index_map; no HBM-side [::-1]).
        lt = jnp.where(d == 0, s, Tb - 1 - s)
        gates = xp_ref[0, lt] + jnp.dot(
            h_prev, whh, preferred_element_type=jnp.float32)   # (B, 4H)
        i_g = jax.nn.sigmoid(gates[:, 0 * H:1 * H])
        f_g = jax.nn.sigmoid(gates[:, 1 * H:2 * H])
        g_g = jnp.tanh(gates[:, 2 * H:3 * H])
        o_g = jax.nn.sigmoid(gates[:, 3 * H:4 * H])
        c_new = f_g * c_prev + i_g * g_g
        h_new = o_g * jnp.tanh(c_new)
        h_out_ref[0, lt] = h_new
        return (h_new, c_new)

    h_fin, c_fin = jax.lax.fori_loop(
        0, Tb, step, (h_st[...], c_st[...]), unroll=True)
    h_st[...] = h_fin
    c_st[...] = c_fin


def bilstm_recurrence(xproj, w_hh):
    """xproj: (2, T, B, 4H), w_hh: (2, H, 4H) -> h_all: (2, T, B, H)."""
    _, T, Bsz, G = xproj.shape
    H = w_hh.shape[1]
    Tb = _divisor_tile(T, 16, 1)          # 8-16 time steps per grid iteration
    nTb = T // Tb

    def rev(d, tb):                        # backward direction walks blocks in reverse
        return (1 - d) * tb + d * (nTb - 1 - tb)

    kernel = functools.partial(_bilstm_rec_kernel, Tb=Tb, H=H)
    return pl.pallas_call(
        kernel,
        out_shape=jax.ShapeDtypeStruct((2, T, Bsz, H), jnp.float32),
        grid_spec=pltpu.PrefetchScalarGridSpec(
            num_scalar_prefetch=0,
            grid=(2, nTb),
            in_specs=[
                pl.BlockSpec((1, Tb, Bsz, G), lambda d, tb: (d, rev(d, tb), 0, 0)),
                pl.BlockSpec((1, H, G), lambda d, tb: (d, 0, 0)),
            ],
            out_specs=pl.BlockSpec((1, Tb, Bsz, H),
                                   lambda d, tb: (d, rev(d, tb), 0, 0)),
            scratch_shapes=[pltpu.VMEM((Bsz, H), jnp.float32),
                            pltpu.VMEM((Bsz, H), jnp.float32)],
        ),
        compiler_params=pltpu.CompilerParams(
            # direction axis "parallel" (v7x: one direction per TensorCore),
            # time axis "arbitrary" (sequential recurrence, scratch carry).
            dimension_semantics=("parallel", "arbitrary")),
    )(xproj, w_hh)


# --------------------------------------------------------------------------
# Kernel 3: tiled Linear + Tanh over batch-major hidden rows
# --------------------------------------------------------------------------
def _linear_tanh_kernel(h_ref, wf_ref, wb_ref, b_ref, o_ref):
    """h_ref : (2, tr, H)  stacked (fwd, bwd) hidden rows (batch-major order)
       wf/wb : (H, tn)     linear weight halves (fwd / bwd hidden)
       b_ref : (1, tn)
       o_ref : (tr, tn)
    """
    y = (jnp.dot(h_ref[0], wf_ref[...], preferred_element_type=jnp.float32)
         + jnp.dot(h_ref[1], wb_ref[...], preferred_element_type=jnp.float32)
         + b_ref[...])
    o_ref[...] = jnp.tanh(y)


def linear_tanh(h_stacked, w_f, w_b, bias):
    """h_stacked: (2, N, H) batch-major rows -> (N, out_dim) = tanh(h @ W + b)."""
    _, N, H = h_stacked.shape
    out_dim = w_f.shape[1]
    # Modest tile caps keep the double-buffered blocks well inside the scoped
    # VMEM limit on all generations (halve further / set vmem_limit_bytes for
    # very large configs on v7x's 64 MiB VMEM).
    tr = _divisor_tile(N, 256, 8)
    tn = _divisor_tile(out_dim, 512, 128)
    nR, nN = N // tr, out_dim // tn

    return pl.pallas_call(
        _linear_tanh_kernel,
        out_shape=jax.ShapeDtypeStruct((N, out_dim), jnp.float32),
        grid_spec=pltpu.PrefetchScalarGridSpec(
            num_scalar_prefetch=0,
            grid=(nR, nN),
            in_specs=[
                pl.BlockSpec((2, tr, H), lambda r, n: (0, r, 0)),
                pl.BlockSpec((H, tn), lambda r, n: (0, n)),
                pl.BlockSpec((H, tn), lambda r, n: (0, n)),
                pl.BlockSpec((1, tn), lambda r, n: (0, n)),
            ],
            out_specs=pl.BlockSpec((tr, tn), lambda r, n: (r, n)),
        ),
        compiler_params=pltpu.CompilerParams(
            dimension_semantics=("parallel", "parallel")),
    )(h_stacked, w_f, w_b, bias)


# --------------------------------------------------------------------------
# DPCL forward (train mode, dropout=0 -> no-op)
# --------------------------------------------------------------------------
def dpcl_forward(x_btf, params, emb_D):
    """x_btf: (B, T, F)  ->  (B, T*F, D)."""
    B, T, F = x_btf.shape
    # One small transpose of the (cheap) raw input to time-major rows; the LSTM
    # stack then stays time-major (what the recurrence needs for contiguous
    # (B, 4H) per-step reads).
    cur = jnp.transpose(x_btf, (1, 0, 2)).reshape(T * B, F)   # rows ordered (t, b)

    H = params["layers"][-1]["w_hh"].shape[1]
    for lp in params["layers"]:
        Hl = lp["w_hh"].shape[1]
        xproj = bilstm_input_proj(cur, lp["w_ih_parts"], lp["bias"], T, B)
        h_all = bilstm_recurrence(xproj.reshape(2, T, B, 4 * Hl), lp["w_hh"])
        cur = h_all.reshape(2, T * B, Hl)  # stacked (fwd, bwd) rows for next stage

    # Time-major -> batch-major rows for the output head.  This single XLA
    # transpose touches the (2H) hidden tensor, which is smaller than the
    # (nfft*D) linear output, so it is the cheapest place to reorder.
    h_bt = jnp.transpose(cur.reshape(2, T, B, H), (0, 2, 1, 3)).reshape(2, B * T, H)
    y = linear_tanh(h_bt, params["lin_wf"], params["lin_wb"], params["lin_b"])
    return y.reshape(B, T * F, emb_D)


# --------------------------------------------------------------------------
# Pure-JAX reference (for verification)
# --------------------------------------------------------------------------
def _lstm_dir_ref(x_tbi, w_ih_t, w_hh_t, bias):
    T, B, _ = x_tbi.shape
    H = w_hh_t.shape[0]
    h = jnp.zeros((B, H), jnp.float32)
    c = jnp.zeros((B, H), jnp.float32)
    outs = []
    for t in range(T):
        gates = x_tbi[t] @ w_ih_t + h @ w_hh_t + bias
        i_g = jax.nn.sigmoid(gates[:, 0 * H:1 * H])
        f_g = jax.nn.sigmoid(gates[:, 1 * H:2 * H])
        g_g = jnp.tanh(gates[:, 2 * H:3 * H])
        o_g = jax.nn.sigmoid(gates[:, 3 * H:4 * H])
        c = f_g * c + i_g * g_g
        h = o_g * jnp.tanh(c)
        outs.append(h)
    return jnp.stack(outs, axis=0)


def dpcl_forward_ref(x_btf, params, emb_D):
    B, T, F = x_btf.shape
    h = jnp.transpose(x_btf, (1, 0, 2))                   # (T, B, F)
    for lp in params["layers"]:
        parts = lp["w_ih_parts"]
        w_ih = parts[0] if len(parts) == 1 else jnp.concatenate(parts, axis=1)
        hf = _lstm_dir_ref(h, w_ih[0], lp["w_hh"][0], lp["bias"][0])
        hb = _lstm_dir_ref(h[::-1], w_ih[1], lp["w_hh"][1], lp["bias"][1])[::-1]
        h = jnp.concatenate([hf, hb], axis=-1)            # (T, B, 2H)
    H = params["layers"][-1]["w_hh"].shape[1]
    y = jnp.tanh(h[..., :H] @ params["lin_wf"]
                 + h[..., H:] @ params["lin_wb"] + params["lin_b"])
    y = jnp.transpose(y, (1, 0, 2))                       # (B, T, F*D)
    return y.reshape(B, T * F, emb_D)


# --------------------------------------------------------------------------
# Deterministic parameter construction (PyTorch-LSTM-compatible layout)
# --------------------------------------------------------------------------
def make_params(key, nfft, hidden, emb_D, num_layers):
    H = hidden
    layers = []
    for layer in range(num_layers):
        in_size = nfft if layer == 0 else 2 * H
        wih, whh, bias = [], [], []
        for _ in range(2):                                # fwd, bwd
            key, k1, k2, k3, k4 = jax.random.split(key, 5)
            w_ih = 0.1 * jax.random.normal(k1, (4 * H, in_size), jnp.float32)
            w_hh = 0.1 * jax.random.normal(k2, (4 * H, H), jnp.float32)
            b_ih = 0.1 * jax.random.normal(k3, (4 * H,), jnp.float32)
            b_hh = 0.1 * jax.random.normal(k4, (4 * H,), jnp.float32)
            wih.append(w_ih.T)                            # (I, 4H)
            whh.append(w_hh.T)                            # (H, 4H)
            bias.append((b_ih + b_hh).reshape(1, 4 * H))
        w_ih_s = jnp.stack(wih)                           # (2, I, 4H)
        layer_p = {"w_hh": jnp.stack(whh),                # (2, H, 4H)
                   "bias": jnp.stack(bias)}               # (2, 1, 4H)
        if layer == 0:
            layer_p["w_ih_parts"] = (w_ih_s,)
        else:                                             # split: fwd-hidden / bwd-hidden halves
            layer_p["w_ih_parts"] = (w_ih_s[:, :H, :], w_ih_s[:, H:, :])
        layers.append(layer_p)

    key, k1, k2 = jax.random.split(key, 3)
    out_dim = nfft * emb_D
    lin_w = 0.1 * jax.random.normal(k1, (out_dim, 2 * H), jnp.float32)
    lin_b = 0.1 * jax.random.normal(k2, (out_dim,), jnp.float32)
    lin_w_t = lin_w.T                                     # (2H, out_dim)
    return {
        "layers": layers,
        "lin_wf": lin_w_t[:H],                            # multiplies h_fwd
        "lin_wb": lin_w_t[H:],                            # multiplies h_bwd
        "lin_b": lin_b.reshape(1, out_dim),
    }


# --------------------------------------------------------------------------
if __name__ == "__main__":
    # Small shapes consistent with DPCL's forward (train: B x T x F in,
    # B x (T*F) x D out).
    B, T, NFFT, HIDDEN, EMB_D, NUM_LAYERS = 2, 8, 16, 32, 8, 2

    key = jax.random.PRNGKey(0)
    key, kx = jax.random.split(key)
    x = jax.random.normal(kx, (B, T, NFFT), jnp.float32)

    params = make_params(key, NFFT, HIDDEN, EMB_D, NUM_LAYERS)

    fwd = jax.jit(functools.partial(dpcl_forward, emb_D=EMB_D))
    out = fwd(x, params)
    jax.block_until_ready(out)

    assert out.shape == (B, T * NFFT, EMB_D), out.shape

    ref = dpcl_forward_ref(x, params, EMB_D)
    max_err = float(jnp.max(jnp.abs(out - ref)))
    assert max_err < 1e-3, max_err

    print("KERNEL_OK")
</pallas_src>

<mosaic_0001>
module attributes {stable_mosaic.version = 11 : i64} {
  func.func @_proj_kernel(%arg0: i32, %arg1: i32, %arg2: memref<16x16xf32, #tpu.memory_space<vmem>>, %arg3: memref<1x16x128xf32, #tpu.memory_space<vmem>>, %arg4: memref<1x1x128xf32, #tpu.memory_space<vmem>>, %arg5: memref<1x16x128xf32, #tpu.memory_space<vmem>>) attributes {dimension_semantics = [#tpu.dimension_semantics<parallel>, #tpu.dimension_semantics<parallel>], iteration_bounds = array<i64: 2, 1>, scalar_prefetch = 0 : i64, scratch_operands = 0 : i64, tpu.core_type = #tpu.core_type<tc>, window_params = [{transform_indices = @transform_0, window_bounds = array<i64: 16, 16>}, {transform_indices = @transform_1, window_bounds = array<i64: 1, 16, 128>}, {transform_indices = @transform_2, window_bounds = array<i64: 1, 1, 128>}, {transform_indices = @transform_3, window_bounds = array<i64: 1, 16, 128>}]} {
    %c0 = arith.constant 0 : index
    %c0_0 = arith.constant 0 : index
    %c0_1 = arith.constant 0 : index
    %0 = vector.load %arg4[%c0, %c0_0, %c0_1] : memref<1x1x128xf32, #tpu.memory_space<vmem>>, vector<1x1x128xf32>
    %1 = vector.shape_cast %0 : vector<1x1x128xf32> to vector<1x128xf32>
    %c0_2 = arith.constant 0 : index
    %c0_3 = arith.constant 0 : index
    %2 = vector.load %arg2[%c0_2, %c0_3] : memref<16x16xf32, #tpu.memory_space<vmem>>, vector<16x16xf32>
    %c0_4 = arith.constant 0 : index
    %c0_5 = arith.constant 0 : index
    %c0_6 = arith.constant 0 : index
    %3 = vector.load %arg3[%c0_4, %c0_5, %c0_6] : memref<1x16x128xf32, #tpu.memory_space<vmem>>, vector<1x16x128xf32>
    %4 = vector.shape_cast %3 : vector<1x16x128xf32> to vector<16x128xf32>
    %cst = arith.constant dense<0.000000e+00> : vector<16x128xf32>
    %5 = tpu.matmul %2, %4, %cst {dimension_numbers = #tpu.dot_dimension_numbers<[1], [0], [0], [1], [0, 0, 1, 1], [], []>} : vector<16x16xf32>, vector<16x128xf32>, vector<16x128xf32> -> vector<16x128xf32>
    %6 = vector.broadcast %1 : vector<1x128xf32> to vector<16x128xf32>
    %7 = arith.addf %6, %5 : vector<16x128xf32>
    %c0_7 = arith.constant 0 : index
    %c0_8 = arith.constant 0 : index
    %c0_9 = arith.constant 0 : index
    %8 = vector.load %arg5[%c0_7, %c0_8, %c0_9] : memref<1x16x128xf32, #tpu.memory_space<vmem>>, vector<1x16x128xf32>
    %9 = vector.shape_cast %8 : vector<1x16x128xf32> to vector<16x128xf32>
    %10 = vector.shape_cast %7 : vector<16x128xf32> to vector<1x16x128xf32>
    tpu.vector_store %arg5[%c0_7, %c0_8, %c0_9], %10 {strides = array<i32>} : memref<1x16x128xf32, #tpu.memory_space<vmem>>, vector<1x16x128xf32>,
    return
  }
  func.func @transform_0(%arg0: i32, %arg1: i32) -> (i32, i32) {
    %c0_i32 = arith.constant 0 : i32
    %c0_i32_0 = arith.constant 0 : i32
    return %arg1, %c0_i32 : i32, i32
  }
  func.func @transform_1(%arg0: i32, %arg1: i32) -> (i32, i32, i32) {
    %c0_i32 = arith.constant 0 : i32
    %c0_i32_0 = arith.constant 0 : i32
    %c0_i32_1 = arith.constant 0 : i32
    return %arg0, %c0_i32, %c0_i32_0 : i32, i32, i32
  }
  func.func @transform_2(%arg0: i32, %arg1: i32) -> (i32, i32, i32) {
    %c0_i32 = arith.constant 0 : i32
    %c0_i32_0 = arith.constant 0 : i32
    %c0_i32_1 = arith.constant 0 : i32
    return %arg0, %c0_i32, %c0_i32_0 : i32, i32, i32
  }
  func.func @transform_3(%arg0: i32, %arg1: i32) -> (i32, i32, i32) {
    %c0_i32 = arith.constant 0 : i32
    %c0_i32_0 = arith.constant 0 : i32
    return %arg0, %arg1, %c0_i32 : i32, i32, i32
  }
}

module attributes {stable_mosaic.version = 11 : i64} {
  func.func @_proj_kernel(%arg0: i32, %arg1: i32, %arg2: memref<1x16x32xf32, #tpu.memory_space<vmem>>, %arg3: memref<1x16x32xf32, #tpu.memory_space<vmem>>, %arg4: memref<1x32x128xf32, #tpu.memory_space<vmem>>, %arg5: memref<1x32x128xf32, #tpu.memory_space<vmem>>, %arg6: memref<1x1x128xf32, #tpu.memory_space<vmem>>, %arg7: memref<1x16x128xf32, #tpu.memory_space<vmem>>) attributes {dimension_semantics = [#tpu.dimension_semantics<parallel>, #tpu.dimension_semantics<parallel>], iteration_bounds = array<i64: 2, 1>, scalar_prefetch = 0 : i64, scratch_operands = 0 : i64, tpu.core_type = #tpu.core_type<tc>, window_params = [{transform_indices = @transform_0, window_bounds = array<i64: 1, 16, 32>}, {transform_indices = @transform_1, window_bounds = array<i64: 1, 16, 32>}, {transform_indices = @transform_2, window_bounds = array<i64: 1, 32, 128>}, {transform_indices = @transform_3, window_bounds = array<i64: 1, 32, 128>}, {transform_indices = @transform_4, window_bounds = array<i64: 1, 1, 128>}, {transform_indices = @transform_5, window_bounds = array<i64: 1, 16, 128>}]} {
    %c0 = arith.constant 0 : index
    %c0_0 = arith.constant 0 : index
    %c0_1 = arith.constant 0 : index
    %0 = vector.load %arg6[%c0, %c0_0, %c0_1] : memref<1x1x128xf32, #tpu.memory_space<vmem>>, vector<1x1x128xf32>
    %1 = vector.shape_cast %0 : vector<1x1x128xf32> to vector<1x128xf32>
    %c0_2 = arith.constant 0 : index
    %c0_3 = arith.constant 0 : index
    %c0_4 = arith.constant 0 : index
    %2 = vector.load %arg2[%c0_2, %c0_3, %c0_4] : memref<1x16x32xf32, #tpu.memory_space<vmem>>, vector<1x16x32xf32>
    %3 = vector.shape_cast %2 : vector<1x16x32xf32> to vector<16x32xf32>
    %c0_5 = arith.constant 0 : index
    %c0_6 = arith.constant 0 : index
    %c0_7 = arith.constant 0 : index
    %4 = vector.load %arg4[%c0_5, %c0_6, %c0_7] : memref<1x32x128xf32, #tpu.memory_space<vmem>>, vector<1x32x128xf32>
    %5 = vector.shape_cast %4 : vector<1x32x128xf32> to vector<32x128xf32>
    %cst = arith.constant dense<0.000000e+00> : vector<16x128xf32>
    %6 = tpu.matmul %3, %5, %cst {dimension_numbers = #tpu.dot_dimension_numbers<[1], [0], [0], [1], [0, 0, 1, 1], [], []>} : vector<16x32xf32>, vector<32x128xf32>, vector<16x128xf32> -> vector<16x128xf32>
    %7 = vector.broadcast %1 : vector<1x128xf32> to vector<16x128xf32>
    %8 = arith.addf %7, %6 : vector<16x128xf32>
    %c0_8 = arith.constant 0 : index
    %c0_9 = arith.constant 0 : index
    %c0_10 = arith.constant 0 : index
    %9 = vector.load %arg3[%c0_8, %c0_9, %c0_10] : memref<1x16x32xf32, #tpu.memory_space<vmem>>, vector<1x16x32xf32>
    %10 = vector.shape_cast %9 : vector<1x16x32xf32> to vector<16x32xf32>
    %c0_11 = arith.constant 0 : index
    %c0_12 = arith.constant 0 : index
    %c0_13 = arith.constant 0 : index
    %11 = vector.load %arg5[%c0_11, %c0_12, %c0_13] : memref<1x32x128xf32, #tpu.memory_space<vmem>>, vector<1x32x128xf32>
    %12 = vector.shape_cast %11 : vector<1x32x128xf32> to vector<32x128xf32>
    %cst_14 = arith.constant dense<0.000000e+00> : vector<16x128xf32>
    %13 = tpu.matmul %10, %12, %cst_14 {dimension_numbers = #tpu.dot_dimension_numbers<[1], [0], [0], [1], [0, 0, 1, 1], [], []>} : vector<16x32xf32>, vector<32x128xf32>, vector<16x128xf32> -> vector<16x128xf32>
    %14 = arith.addf %8, %13 : vector<16x128xf32>
    %c0_15 = arith.constant 0 : index
    %c0_16 = arith.constant 0 : index
    %c0_17 = arith.constant 0 : index
    %15 = vector.load %arg7[%c0_15, %c0_16, %c0_17] : memref<1x16x128xf32, #tpu.memory_space<vmem>>, vector<1x16x128xf32>
    %16 = vector.shape_cast %15 : vector<1x16x128xf32> to vector<16x128xf32>
    %17 = vector.shape_cast %14 : vector<16x128xf32> to vector<1x16x128xf32>
    tpu.vector_store %arg7[%c0_15, %c0_16, %c0_17], %17 {strides = array<i32>} : memref<1x16x128xf32, #tpu.memory_space<vmem>>, vector<1x16x128xf32>,
    return
  }
  func.func @transform_0(%arg0: i32, %arg1: i32) -> (i32, i32, i32) {
    %c0_i32 = arith.constant 0 : i32
    %c0_i32_0 = arith.constant 0 : i32
    %c0_i32_1 = arith.constant 0 : i32
    return %c0_i32, %arg1, %c0_i32_0 : i32, i32, i32
  }
  func.func @transform_1(%arg0: i32, %arg1: i32) -> (i32, i32, i32) {
    %c1_i32 = arith.constant 1 : i32
    %c0_i32 = arith.constant 0 : i32
    %c0_i32_0 = arith.constant 0 : i32
    return %c1_i32, %arg1, %c0_i32 : i32, i32, i32
  }
  func.func @transform_2(%arg0: i32, %arg1: i32) -> (i32, i32, i32) {
    %c0_i32 = arith.constant 0 : i32
    %c0_i32_0 = arith.constant 0 : i32
    %c0_i32_1 = arith.constant 0 : i32
    return %arg0, %c0_i32, %c0_i32_0 : i32, i32, i32
  }
  func.func @transform_3(%arg0: i32, %arg1: i32) -> (i32, i32, i32) {
    %c0_i32 = arith.constant 0 : i32
    %c0_i32_0 = arith.constant 0 : i32
    %c0_i32_1 = arith.constant 0 : i32
    return %arg0, %c0_i32, %c0_i32_0 : i32, i32, i32
  }
  func.func @transform_4(%arg0: i32, %arg1: i32) -> (i32, i32, i32) {
    %c0_i32 = arith.constant 0 : i32
    %c0_i32_0 = arith.constant 0 : i32
    %c0_i32_1 = arith.constant 0 : i32
    return %arg0, %c0_i32, %c0_i32_0 : i32, i32, i32
  }
  func.func @transform_5(%arg0: i32, %arg1: i32) -> (i32, i32, i32) {
    %c0_i32 = arith.constant 0 : i32
    %c0_i32_0 = arith.constant 0 : i32
    return %arg0, %arg1, %c0_i32 : i32, i32, i32
  }
}

module attributes {stable_mosaic.version = 11 : i64} {
  func.func @_bilstm_rec_kernel(%arg0: i32, %arg1: i32, %arg2: memref<1x8x2x128xf32, #tpu.memory_space<vmem>>, %arg3: memref<1x32x128xf32, #tpu.memory_space<vmem>>, %arg4: memref<1x8x2x32xf32, #tpu.memory_space<vmem>>, %arg5: memref<2x32xf32, #tpu.memory_space<vmem>>, %arg6: memref<2x32xf32, #tpu.memory_space<vmem>>) attributes {dimension_semantics = [#tpu.dimension_semantics<parallel>, #tpu.dimension_semantics<arbitrary>], iteration_bounds = array<i64: 2, 1>, scalar_prefetch = 0 : i64, scratch_operands = 2 : i64, tpu.core_type = #tpu.core_type<tc>, window_params = [{transform_indices = @transform_0, window_bounds = array<i64: 1, 8, 2, 128>}, {transform_indices = @transform_1, window_bounds = array<i64: 1, 32, 128>}, {transform_indices = @transform_2, window_bounds = array<i64: 1, 8, 2, 32>}]} {
    %c0_i32 = arith.constant 0 : i32
    %0 = arith.cmpi eq, %arg1, %c0_i32 : i32
    %1 = arith.extui %0 : i1 to i32
    %c0_i32_0 = arith.constant 0 : i32
    %2 = arith.cmpi ne, %1, %c0_i32_0 : i32
    scf.if %2 {
      %cst_107 = arith.constant 0.000000e+00 : f32
      %305 = vector.broadcast %cst_107 : f32 to vector<2x32xf32>
      %c0_108 = arith.constant 0 : index
      %c0_109 = arith.constant 0 : index
      %306 = vector.load %arg5[%c0_108, %c0_109] : memref<2x32xf32, #tpu.memory_space<vmem>>, vector<2x32xf32>
      tpu.vector_store %arg5[%c0_108, %c0_109], %305 {strides = array<i32>} : memref<2x32xf32, #tpu.memory_space<vmem>>, vector<2x32xf32>,
      %cst_110 = arith.constant 0.000000e+00 : f32
      %307 = vector.broadcast %cst_110 : f32 to vector<2x32xf32>
      %c0_111 = arith.constant 0 : index
      %c0_112 = arith.constant 0 : index
      %308 = vector.load %arg6[%c0_111, %c0_112] : memref<2x32xf32, #tpu.memory_space<vmem>>, vector<2x32xf32>
      tpu.vector_store %arg6[%c0_111, %c0_112], %307 {strides = array<i32>} : memref<2x32xf32, #tpu.memory_space<vmem>>, vector<2x32xf32>,
    } else {
    }
    %c0 = arith.constant 0 : index
    %c0_1 = arith.constant 0 : index
    %c0_2 = arith.constant 0 : index
    %3 = vector.load %arg3[%c0, %c0_1, %c0_2] : memref<1x32x128xf32, #tpu.memory_space<vmem>>, vector<1x32x128xf32>
    %4 = vector.shape_cast %3 : vector<1x32x128xf32> to vector<32x128xf32>
    %c0_3 = arith.constant 0 : index
    %c0_4 = arith.constant 0 : index
    %5 = vector.load %arg5[%c0_3, %c0_4] : memref<2x32xf32, #tpu.memory_space<vmem>>, vector<2x32xf32>
    %c0_5 = arith.constant 0 : index
    %c0_6 = arith.constant 0 : index
    %6 = vector.load %arg6[%c0_5, %c0_6] : memref<2x32xf32, #tpu.memory_space<vmem>>, vector<2x32xf32>
    %c0_i32_7 = arith.constant 0 : i32
    %c0_i32_8 = arith.constant 0 : i32
    %7 = arith.cmpi eq, %arg0, %c0_i32_8 : i32
    %c7_i32 = arith.constant 7 : i32
    %8 = arith.subi %c7_i32, %c0_i32_7 : i32
    %9 = arith.select %7, %c0_i32_7, %8 : i32
    %c0_9 = arith.constant 0 : index
    %10 = arith.index_cast %9 : i32 to index
    %c0_10 = arith.constant 0 : index
    %c0_11 = arith.constant 0 : index
    %11 = vector.load %arg2[%c0_9, %10, %c0_10, %c0_11] : memref<1x8x2x128xf32, #tpu.memory_space<vmem>>, vector<1x1x2x128xf32>
    %12 = vector.shape_cast %11 : vector<1x1x2x128xf32> to vector<2x128xf32>
    %cst = arith.constant dense<0.000000e+00> : vector<2x128xf32>
    %13 = tpu.matmul %5, %4, %cst {dimension_numbers = #tpu.dot_dimension_numbers<[1], [0], [0], [1], [0, 0, 1, 1], [], []>} : vector<2x32xf32>, vector<32x128xf32>, vector<2x128xf32> -> vector<2x128xf32>
    %14 = arith.addf %12, %13 : vector<2x128xf32>
    %15 = vector.extract_strided_slice %14 {offsets = [0, 0], sizes = [2, 32], strides = [1, 1]} : vector<2x128xf32> to vector<2x32xf32>
    %16 = arith.negf %15 : vector<2x32xf32>
    %17 = math.exp %16 : vector<2x32xf32>
    %cst_12 = arith.constant 1.000000e+00 : f32
    %18 = vector.broadcast %cst_12 : f32 to vector<2x32xf32>
    %19 = arith.addf %18, %17 : vector<2x32xf32>
    %20 = arith.divf %18, %19 : vector<2x32xf32>
    %21 = vector.extract_strided_slice %14 {offsets = [0, 32], sizes = [2, 32], strides = [1, 1]} : vector<2x128xf32> to vector<2x32xf32>
    %22 = arith.negf %21 : vector<2x32xf32>
    %23 = math.exp %22 : vector<2x32xf32>
    %cst_13 = arith.constant 1.000000e+00 : f32
    %24 = vector.broadcast %cst_13 : f32 to vector<2x32xf32>
    %25 = arith.addf %24, %23 : vector<2x32xf32>
    %26 = arith.divf %24, %25 : vector<2x32xf32>
    %27 = vector.extract_strided_slice %14 {offsets = [0, 64], sizes = [2, 32], strides = [1, 1]} : vector<2x128xf32> to vector<2x32xf32>
    %28 = math.tanh %27 : vector<2x32xf32>
    %29 = vector.extract_strided_slice %14 {offsets = [0, 96], sizes = [2, 32], strides = [1, 1]} : vector<2x128xf32> to vector<2x32xf32>
    %30 = arith.negf %29 : vector<2x32xf32>
    %31 = math.exp %30 : vector<2x32xf32>
    %cst_14 = arith.constant 1.000000e+00 : f32
    %32 = vector.broadcast %cst_14 : f32 to vector<2x32xf32>
    %33 = arith.addf %32, %31 : vector<2x32xf32>
    %34 = arith.divf %32, %33 : vector<2x32xf32>
    %35 = arith.mulf %26, %6 : vector<2x32xf32>
    %36 = arith.mulf %20, %28 : vector<2x32xf32>
    %37 = arith.addf %35, %36 : vector<2x32xf32>
    %38 = math.tanh %37 : vector<2x32xf32>
    %39 = arith.mulf %34, %38 : vector<2x32xf32>
    %c0_15 = arith.constant 0 : index
    %40 = arith.index_cast %9 : i32 to index
    %c0_16 = arith.constant 0 : index
    %c0_17 = arith.constant 0 : index
    %41 = vector.load %arg4[%c0_15, %40, %c0_16, %c0_17] : memref<1x8x2x32xf32, #tpu.memory_space<vmem>>, vector<1x1x2x32xf32>
    %42 = vector.shape_cast %41 : vector<1x1x2x32xf32> to vector<2x32xf32>
    %43 = vector.shape_cast %39 : vector<2x32xf32> to vector<1x1x2x32xf32>
    tpu.vector_store %arg4[%c0_15, %40, %c0_16, %c0_17], %43 {strides = array<i32>} : memref<1x8x2x32xf32, #tpu.memory_space<vmem>>, vector<1x1x2x32xf32>,
    %c1_i32 = arith.constant 1 : i32
    %c0_i32_18 = arith.constant 0 : i32
    %44 = arith.cmpi eq, %arg0, %c0_i32_18 : i32
    %c7_i32_19 = arith.constant 7 : i32
    %45 = arith.subi %c7_i32_19, %c1_i32 : i32
    %46 = arith.select %44, %c1_i32, %45 : i32
    %c0_20 = arith.constant 0 : index
    %47 = arith.index_cast %46 : i32 to index
    %c0_21 = arith.constant 0 : index
    %c0_22 = arith.constant 0 : index
    %48 = vector.load %arg2[%c0_20, %47, %c0_21, %c0_22] : memref<1x8x2x128xf32, #tpu.memory_space<vmem>>, vector<1x1x2x128xf32>
    %49 = vector.shape_cast %48 : vector<1x1x2x128xf32> to vector<2x128xf32>
    %cst_23 = arith.constant dense<0.000000e+00> : vector<2x128xf32>
    %50 = tpu.matmul %39, %4, %cst_23 {dimension_numbers = #tpu.dot_dimension_numbers<[1], [0], [0], [1], [0, 0, 1, 1], [], []>} : vector<2x32xf32>, vector<32x128xf32>, vector<2x128xf32> -> vector<2x128xf32>
    %51 = arith.addf %49, %50 : vector<2x128xf32>
    %52 = vector.extract_strided_slice %51 {offsets = [0, 0], sizes = [2, 32], strides = [1, 1]} : vector<2x128xf32> to vector<2x32xf32>
    %53 = arith.negf %52 : vector<2x32xf32>
    %54 = math.exp %53 : vector<2x32xf32>
    %cst_24 = arith.constant 1.000000e+00 : f32
    %55 = vector.broadcast %cst_24 : f32 to vector<2x32xf32>
    %56 = arith.addf %55, %54 : vector<2x32xf32>
    %57 = arith.divf %55, %56 : vector<2x32xf32>
    %58 = vector.extract_strided_slice %51 {offsets = [0, 32], sizes = [2, 32], strides = [1, 1]} : vector<2x128xf32> to vector<2x32xf32>
    %59 = arith.negf %58 : vector<2x32xf32>
    %60 = math.exp %59 : vector<2x32xf32>
    %cst_25 = arith.constant 1.000000e+00 : f32
    %61 = vector.broadcast %cst_25 : f32 to vector<2x32xf32>
    %62 = arith.addf %61, %60 : vector<2x32xf32>
    %63 = arith.divf %61, %62 : vector<2x32xf32>
    %64 = vector.extract_strided_slice %51 {offsets = [0, 64], sizes = [2, 32], strides = [1, 1]} : vector<2x128xf32> to vector<2x32xf32>
    %65 = math.tanh %64 : vector<2x32xf32>
    %66 = vector.extract_strided_slice %51 {offsets = [0, 96], sizes = [2, 32], strides = [1, 1]} : vector<2x128xf32> to vector<2x32xf32>
    %67 = arith.negf %66 : vector<2x32xf32>
    %68 = math.exp %67 : vector<2x32xf32>
    %cst_26 = arith.constant 1.000000e+00 : f32
    %69 = vector.broadcast %cst_26 : f32 to vector<2x32xf32>
    %70 = arith.addf %69, %68 : vector<2x32xf32>
    %71 = arith.divf %69, %70 : vector<2x32xf32>
    %72 = arith.mulf %63, %37 : vector<2x32xf32>
    %73 = arith.mulf %57, %65 : vector<2x32xf32>
    %74 = arith.addf %72, %73 : vector<2x32xf32>
    %75 = math.tanh %74 : vector<2x32xf32>
    %76 = arith.mulf %71, %75 : vector<2x32xf32>
    %c0_27 = arith.constant 0 : index
    %77 = arith.index_cast %46 : i32 to index
    %c0_28 = arith.constant 0 : index
    %c0_29 = arith.constant 0 : index
    %78 = vector.load %arg4[%c0_27, %77, %c0_28, %c0_29] : memref<1x8x2x32xf32, #tpu.memory_space<vmem>>, vector<1x1x2x32xf32>
    %79 = vector.shape_cast %78 : vector<1x1x2x32xf32> to vector<2x32xf32>
    %80 = vector.shape_cast %76 : vector<2x32xf32> to vector<1x1x2x32xf32>
    tpu.vector_store %arg4[%c0_27, %77, %c0_28, %c0_29], %80 {strides = array<i32>} : memref<1x8x2x32xf32, #tpu.memory_space<vmem>>, vector<1x1x2x32xf32>,
    %c2_i32 = arith.constant 2 : i32
    %c0_i32_30 = arith.constant 0 : i32
    %81 = arith.cmpi eq, %arg0, %c0_i32_30 : i32
    %c7_i32_31 = arith.constant 7 : i32
    %82 = arith.subi %c7_i32_31, %c2_i32 : i32
    %83 = arith.select %81, %c2_i32, %82 : i32
    %c0_32 = arith.constant 0 : index
    %84 = arith.index_cast %83 : i32 to index
    %c0_33 = arith.constant 0 : index
    %c0_34 = arith.constant 0 : index
    %85 = vector.load %arg2[%c0_32, %84, %c0_33, %c0_34] : memref<1x8x2x128xf32, #tpu.memory_space<vmem>>, vector<1x1x2x128xf32>
    %86 = vector.shape_cast %85 : vector<1x1x2x128xf32> to vector<2x128xf32>
    %cst_35 = arith.constant dense<0.000000e+00> : vector<2x128xf32>
    %87 = tpu.matmul %76, %4, %cst_35 {dimension_numbers = #tpu.dot_dimension_numbers<[1], [0], [0], [1], [0, 0, 1, 1], [], []>} : vector<2x32xf32>, vector<32x128xf32>, vector<2x128xf32> -> vector<2x128xf32>
    %88 = arith.addf %86, %87 : vector<2x128xf32>
    %89 = vector.extract_strided_slice %88 {offsets = [0, 0], sizes = [2, 32], strides = [1, 1]} : vector<2x128xf32> to vector<2x32xf32>
    %90 = arith.negf %89 : vector<2x32xf32>
    %91 = math.exp %90 : vector<2x32xf32>
    %cst_36 = arith.constant 1.000000e+00 : f32
    %92 = vector.broadcast %cst_36 : f32 to vector<2x32xf32>
    %93 = arith.addf %92, %91 : vector<2x32xf32>
    %94 = arith.divf %92, %93 : vector<2x32xf32>
    %95 = vector.extract_strided_slice %88 {offsets = [0, 32], sizes = [2, 32], strides = [1, 1]} : vector<2x128xf32> to vector<2x32xf32>
    %96 = arith.negf %95 : vector<2x32xf32>
    %97 = math.exp %96 : vector<2x32xf32>
    %cst_37 = arith.constant 1.000000e+00 : f32
    %98 = vector.broadcast %cst_37 : f32 to vector<2x32xf32>
    %99 = arith.addf %98, %97 : vector<2x32xf32>
    %100 = arith.divf %98, %99 : vector<2x32xf32>
    %101 = vector.extract_strided_slice %88 {offsets = [0, 64], sizes = [2, 32], strides = [1, 1]} : vector<2x128xf32> to vector<2x32xf32>
    %102 = math.tanh %101 : vector<2x32xf32>
    %103 = vector.extract_strided_slice %88 {offsets = [0, 96], sizes = [2, 32], strides = [1, 1]} : vector<2x128xf32> to vector<2x32xf32>
    %104 = arith.negf %103 : vector<2x32xf32>
    %105 = math.exp %104 : vector<2x32xf32>
    %cst_38 = arith.constant 1.000000e+00 : f32
    %106 = vector.broadcast %cst_38 : f32 to vector<2x32xf32>
    %107 = arith.addf %106, %105 : vector<2x32xf32>
    %108 = arith.divf %106, %107 : vector<2x32xf32>
    %109 = arith.mulf %100, %74 : vector<2x32xf32>
    %110 = arith.mulf %94, %102 : vector<2x32xf32>
    %111 = arith.addf %109, %110 : vector<2x32xf32>
    %112 = math.tanh %111 : vector<2x32xf32>
    %113 = arith.mulf %108, %112 : vector<2x32xf32>
    %c0_39 = arith.constant 0 : index
    %114 = arith.index_cast %83 : i32 to index
    %c0_40 = arith.constant 0 : index
    %c0_41 = arith.constant 0 : index
    %115 = vector.load %arg4[%c0_39, %114, %c0_40, %c0_41] : memref<1x8x2x32xf32, #tpu.memory_space<vmem>>, vector<1x1x2x32xf32>
    %116 = vector.shape_cast %115 : vector<1x1x2x32xf32> to vector<2x32xf32>
    %117 = vector.shape_cast %113 : vector<2x32xf32> to vector<1x1x2x32xf32>
    tpu.vector_store %arg4[%c0_39, %114, %c0_40, %c0_41], %117 {strides = array<i32>} : memref<1x8x2x32xf32, #tpu.memory_space<vmem>>, vector<1x1x2x32xf32>,
    %c3_i32 = arith.constant 3 : i32
    %c0_i32_42 = arith.constant 0 : i32
    %118 = arith.cmpi eq, %arg0, %c0_i32_42 : i32
    %c7_i32_43 = arith.constant 7 : i32
    %119 = arith.subi %c7_i32_43, %c3_i32 : i32
    %120 = arith.select %118, %c3_i32, %119 : i32
    %c0_44 = arith.constant 0 : index
    %121 = arith.index_cast %120 : i32 to index
    %c0_45 = arith.constant 0 : index
    %c0_46 = arith.constant 0 : index
    %122 = vector.load %arg2[%c0_44, %121, %c0_45, %c0_46] : memref<1x8x2x128xf32, #tpu.memory_space<vmem>>, vector<1x1x2x128xf32>
    %123 = vector.shape_cast %122 : vector<1x1x2x128xf32> to vector<2x128xf32>
    %cst_47 = arith.constant dense<0.000000e+00> : vector<2x128xf32>
    %124 = tpu.matmul %113, %4, %cst_47 {dimension_numbers = #tpu.dot_dimension_numbers<[1], [0], [0], [1], [0, 0, 1, 1], [], []>} : vector<2x32xf32>, vector<32x128xf32>, vector<2x128xf32> -> vector<2x128xf32>
    %125 = arith.addf %123, %124 : vector<2x128xf32>
    %126 = vector.extract_strided_slice %125 {offsets = [0, 0], sizes = [2, 32], strides = [1, 1]} : vector<2x128xf32> to vector<2x32xf32>
    %127 = arith.negf %126 : vector<2x32xf32>
    %128 = math.exp %127 : vector<2x32xf32>
    %cst_48 = arith.constant 1.000000e+00 : f32
    %129 = vector.broadcast %cst_48 : f32 to vector<2x32xf32>
    %130 = arith.addf %129, %128 : vector<2x32xf32>
    %131 = arith.divf %129, %130 : vector<2x32xf32>
    %132 = vector.extract_strided_slice %125 {offsets = [0, 32], sizes = [2, 32], strides = [1, 1]} : vector<2x128xf32> to vector<2x32xf32>
    %133 = arith.negf %132 : vector<2x32xf32>
    %134 = math.exp %133 : vector<2x32xf32>
    %cst_49 = arith.constant 1.000000e+00 : f32
    %135 = vector.broadcast %cst_49 : f32 to vector<2x32xf32>
    %136 = arith.addf %135, %134 : vector<2x32xf32>
    %137 = arith.divf %135, %136 : vector<2x32xf32>
    %138 = vector.extract_strided_slice %125 {offsets = [0, 64], sizes = [2, 32], strides = [1, 1]} : vector<2x128xf32> to vector<2x32xf32>
    %139 = math.tanh %138 : vector<2x32xf32>
    %140 = vector.extract_strided_slice %125 {offsets = [0, 96], sizes = [2, 32], strides = [1, 1]} : vector<2x128xf32> to vector<2x32xf32>
    %141 = arith.negf %140 : vector<2x32xf32>
    %142 = math.exp %141 : vector<2x32xf32>
    %cst_50 = arith.constant 1.000000e+00 : f32
    %143 = vector.broadcast %cst_50 : f32 to vector<2x32xf32>
    %144 = arith.addf %143, %142 : vector<2x32xf32>
    %145 = arith.divf %143, %144 : vector<2x32xf32>
    %146 = arith.mulf %137, %111 : vector<2x32xf32>
    %147 = arith.mulf %131, %139 : vector<2x32xf32>
    %148 = arith.addf %146, %147 : vector<2x32xf32>
    %149 = math.tanh %148 : vector<2x32xf32>
    %150 = arith.mulf %145, %149 : vector<2x32xf32>
    %c0_51 = arith.constant 0 : index
    %151 = arith.index_cast %120 : i32 to index
    %c0_52 = arith.constant 0 : index
    %c0_53 = arith.constant 0 : index
    %152 = vector.load %arg4[%c0_51, %151, %c0_52, %c0_53] : memref<1x8x2x32xf32, #tpu.memory_space<vmem>>, vector<1x1x2x32xf32>
    %153 = vector.shape_cast %152 : vector<1x1x2x32xf32> to vector<2x32xf32>
    %154 = vector.shape_cast %150 : vector<2x32xf32> to vector<1x1x2x32xf32>
    tpu.vector_store %arg4[%c0_51, %151, %c0_52, %c0_53], %154 {strides = array<i32>} : memref<1x8x2x32xf32, #tpu.memory_space<vmem>>, vector<1x1x2x32xf32>,
    %c4_i32 = arith.constant 4 : i32
    %c0_i32_54 = arith.constant 0 : i32
    %155 = arith.cmpi eq, %arg0, %c0_i32_54 : i32
    %c7_i32_55 = arith.constant 7 : i32
    %156 = arith.subi %c7_i32_55, %c4_i32 : i32
    %157 = arith.select %155, %c4_i32, %156 : i32
    %c0_56 = arith.constant 0 : index
    %158 = arith.index_cast %157 : i32 to index
    %c0_57 = arith.constant 0 : index
    %c0_58 = arith.constant 0 : index
    %159 = vector.load %arg2[%c0_56, %158, %c0_57, %c0_58] : memref<1x8x2x128xf32, #tpu.memory_space<vmem>>, vector<1x1x2x128xf32>
    %160 = vector.shape_cast %159 : vector<1x1x2x128xf32> to vector<2x128xf32>
    %cst_59 = arith.constant dense<0.000000e+00> : vector<2x128xf32>
    %161 = tpu.matmul %150, %4, %cst_59 {dimension_numbers = #tpu.dot_dimension_numbers<[1], [0], [0], [1], [0, 0, 1, 1], [], []>} : vector<2x32xf32>, vector<32x128xf32>, vector<2x128xf32> -> vector<2x128xf32>
    %162 = arith.addf %160, %161 : vector<2x128xf32>
    %163 = vector.extract_strided_slice %162 {offsets = [0, 0], sizes = [2, 32], strides = [1, 1]} : vector<2x128xf32> to vector<2x32xf32>
    %164 = arith.negf %163 : vector<2x32xf32>
    %165 = math.exp %164 : vector<2x32xf32>
    %cst_60 = arith.constant 1.000000e+00 : f32
    %166 = vector.broadcast %cst_60 : f32 to vector<2x32xf32>
    %167 = arith.addf %166, %165 : vector<2x32xf32>
    %168 = arith.divf %166, %167 : vector<2x32xf32>
    %169 = vector.extract_strided_slice %162 {offsets = [0, 32], sizes = [2, 32], strides = [1, 1]} : vector<2x128xf32> to vector<2x32xf32>
    %170 = arith.negf %169 : vector<2x32xf32>
    %171 = math.exp %170 : vector<2x32xf32>
    %cst_61 = arith.constant 1.000000e+00 : f32
    %172 = vector.broadcast %cst_61 : f32 to vector<2x32xf32>
    %173 = arith.addf %172, %171 : vector<2x32xf32>
    %174 = arith.divf %172, %173 : vector<2x32xf32>
    %175 = vector.extract_strided_slice %162 {offsets = [0, 64], sizes = [2, 32], strides = [1, 1]} : vector<2x128xf32> to vector<2x32xf32>
    %176 = math.tanh %175 : vector<2x32xf32>
    %177 = vector.extract_strided_slice %162 {offsets = [0, 96], sizes = [2, 32], strides = [1, 1]} : vector<2x128xf32> to vector<2x32xf32>
    %178 = arith.negf %177 : vector<2x32xf32>
    %179 = math.exp %178 : vector<2x32xf32>
    %cst_62 = arith.constant 1.000000e+00 : f32
    %180 = vector.broadcast %cst_62 : f32 to vector<2x32xf32>
    %181 = arith.addf %180, %179 : vector<2x32xf32>
    %182 = arith.divf %180, %181 : vector<2x32xf32>
    %183 = arith.mulf %174, %148 : vector<2x32xf32>
    %184 = arith.mulf %168, %176 : vector<2x32xf32>
    %185 = arith.addf %183, %184 : vector<2x32xf32>
    %186 = math.tanh %185 : vector<2x32xf32>
    %187 = arith.mulf %182, %186 : vector<2x32xf32>
    %c0_63 = arith.constant 0 : index
    %188 = arith.index_cast %157 : i32 to index
    %c0_64 = arith.constant 0 : index
    %c0_65 = arith.constant 0 : index
    %189 = vector.load %arg4[%c0_63, %188, %c0_64, %c0_65] : memref<1x8x2x32xf32, #tpu.memory_space<vmem>>, vector<1x1x2x32xf32>
    %190 = vector.shape_cast %189 : vector<1x1x2x32xf32> to vector<2x32xf32>
    %191 = vector.shape_cast %187 : vector<2x32xf32> to vector<1x1x2x32xf32>
    tpu.vector_store %arg4[%c0_63, %188, %c0_64, %c0_65], %191 {strides = array<i32>} : memref<1x8x2x32xf32, #tpu.memory_space<vmem>>, vector<1x1x2x32xf32>,
    %c5_i32 = arith.constant 5 : i32
    %c0_i32_66 = arith.constant 0 : i32
    %192 = arith.cmpi eq, %arg0, %c0_i32_66 : i32
    %c7_i32_67 = arith.constant 7 : i32
    %193 = arith.subi %c7_i32_67, %c5_i32 : i32
    %194 = arith.select %192, %c5_i32, %193 : i32
    %c0_68 = arith.constant 0 : index
    %195 = arith.index_cast %194 : i32 to index
    %c0_69 = arith.constant 0 : index
    %c0_70 = arith.constant 0 : index
    %196 = vector.load %arg2[%c0_68, %195, %c0_69, %c0_70] : memref<1x8x2x128xf32, #tpu.memory_space<vmem>>, vector<1x1x2x128xf32>
    %197 = vector.shape_cast %196 : vector<1x1x2x128xf32> to vector<2x128xf32>
    %cst_71 = arith.constant dense<0.000000e+00> : vector<2x128xf32>
    %198 = tpu.matmul %187, %4, %cst_71 {dimension_numbers = #tpu.dot_dimension_numbers<[1], [0], [0], [1], [0, 0, 1, 1], [], []>} : vector<2x32xf32>, vector<32x128xf32>, vector<2x128xf32> -> vector<2x128xf32>
    %199 = arith.addf %197, %198 : vector<2x128xf32>
    %200 = vector.extract_strided_slice %199 {offsets = [0, 0], sizes = [2, 32], strides = [1, 1]} : vector<2x128xf32> to vector<2x32xf32>
    %201 = arith.negf %200 : vector<2x32xf32>
    %202 = math.exp %201 : vector<2x32xf32>
    %cst_72 = arith.constant 1.000000e+00 : f32
    %203 = vector.broadcast %cst_72 : f32 to vector<2x32xf32>
    %204 = arith.addf %203, %202 : vector<2x32xf32>
    %205 = arith.divf %203, %204 : vector<2x32xf32>
    %206 = vector.extract_strided_slice %199 {offsets = [0, 32], sizes = [2, 32], strides = [1, 1]} : vector<2x128xf32> to vector<2x32xf32>
    %207 = arith.negf %206 : vector<2x32xf32>
    %208 = math.exp %207 : vector<2x32xf32>
    %cst_73 = arith.constant 1.000000e+00 : f32
    %209 = vector.broadcast %cst_73 : f32 to vector<2x32xf32>
    %210 = arith.addf %209, %208 : vector<2x32xf32>
    %211 = arith.divf %209, %210 : vector<2x32xf32>
    %212 = vector.extract_strided_slice %199 {offsets = [0, 64], sizes = [2, 32], strides = [1, 1]} : vector<2x128xf32> to vector<2x32xf32>
    %213 = math.tanh %212 : vector<2x32xf32>
    %214 = vector.extract_strided_slice %199 {offsets = [0, 96], sizes = [2, 32], strides = [1, 1]} : vector<2x128xf32> to vector<2x32xf32>
    %215 = arith.negf %214 : vector<2x32xf32>
    %216 = math.exp %215 : vector<2x32xf32>
    %cst_74 = arith.constant 1.000000e+00 : f32
    %217 = vector.broadcast %cst_74 : f32 to vector<2x32xf32>
    %218 = arith.addf %217, %216 : vector<2x32xf32>
    %219 = arith.divf %217, %218 : vector<2x32xf32>
    %220 = arith.mulf %211, %185 : vector<2x32xf32>
    %221 = arith.mulf %205, %213 : vector<2x32xf32>
    %222 = arith.addf %220, %221 : vector<2x32xf32>
    %223 = math.tanh %222 : vector<2x32xf32>
    %224 = arith.mulf %219, %223 : vector<2x32xf32>
    %c0_75 = arith.constant 0 : index
    %225 = arith.index_cast %194 : i32 to index
    %c0_76 = arith.constant 0 : index
    %c0_77 = arith.constant 0 : index
    %226 = vector.load %arg4[%c0_75, %225, %c0_76, %c0_77] : memref<1x8x2x32xf32, #tpu.memory_space<vmem>>, vector<1x1x2x32xf32>
    %227 = vector.shape_cast %226 : vector<1x1x2x32xf32> to vector<2x32xf32>
    %228 = vector.shape_cast %224 : vector<2x32xf32> to vector<1x1x2x32xf32>
    tpu.vector_store %arg4[%c0_75, %225, %c0_76, %c0_77], %228 {strides = array<i32>} : memref<1x8x2x32xf32, #tpu.memory_space<vmem>>, vector<1x1x2x32xf32>,
    %c6_i32 = arith.constant 6 : i32
    %c0_i32_78 = arith.constant 0 : i32
    %229 = arith.cmpi eq, %arg0, %c0_i32_78 : i32
    %c7_i32_79 = arith.constant 7 : i32
    %230 = arith.subi %c7_i32_79, %c6_i32 : i32
    %231 = arith.select %229, %c6_i32, %230 : i32
    %c0_80 = arith.constant 0 : index
    %232 = arith.index_cast %231 : i32 to index
    %c0_81 = arith.constant 0 : index
    %c0_82 = arith.constant 0 : index
    %233 = vector.load %arg2[%c0_80, %232, %c0_81, %c0_82] : memref<1x8x2x128xf32, #tpu.memory_space<vmem>>, vector<1x1x2x128xf32>
    %234 = vector.shape_cast %233 : vector<1x1x2x128xf32> to vector<2x128xf32>
    %cst_83 = arith.constant dense<0.000000e+00> : vector<2x128xf32>
    %235 = tpu.matmul %224, %4, %cst_83 {dimension_numbers = #tpu.dot_dimension_numbers<[1], [0], [0], [1], [0, 0, 1, 1], [], []>} : vector<2x32xf32>, vector<32x128xf32>, vector<2x128xf32> -> vector<2x128xf32>
    %236 = arith.addf %234, %235 : vector<2x128xf32>
    %237 = vector.extract_strided_slice %236 {offsets = [0, 0], sizes = [2, 32], strides = [1, 1]} : vector<2x128xf32> to vector<2x32xf32>
    %238 = arith.negf %237 : vector<2x32xf32>
    %239 = math.exp %238 : vector<2x32xf32>
    %cst_84 = arith.constant 1.000000e+00 : f32
    %240 = vector.broadcast %cst_84 : f32 to vector<2x32xf32>
    %241 = arith.addf %240, %239 : vector<2x32xf32>
    %242 = arith.divf %240, %241 : vector<2x32xf32>
    %243 = vector.extract_strided_slice %236 {offsets = [0, 32], sizes = [2, 32], strides = [1, 1]} : vector<2x128xf32> to vector<2x32xf32>
    %244 = arith.negf %243 : vector<2x32xf32>
    %245 = math.exp %244 : vector<2x32xf32>
    %cst_85 = arith.constant 1.000000e+00 : f32
    %246 = vector.broadcast %cst_85 : f32 to vector<2x32xf32>
    %247 = arith.addf %246, %245 : vector<2x32xf32>
    %248 = arith.divf %246, %247 : vector<2x32xf32>
    %249 = vector.extract_strided_slice %236 {offsets = [0, 64], sizes = [2, 32], strides = [1, 1]} : vector<2x128xf32> to vector<2x32xf32>
    %250 = math.tanh %249 : vector<2x32xf32>
    %251 = vector.extract_strided_slice %236 {offsets = [0, 96], sizes = [2, 32], strides = [1, 1]} : vector<2x128xf32> to vector<2x32xf32>
    %252 = arith.negf %251 : vector<2x32xf32>
    %253 = math.exp %252 : vector<2x32xf32>
    %cst_86 = arith.constant 1.000000e+00 : f32
    %254 = vector.broadcast %cst_86 : f32 to vector<2x32xf32>
    %255 = arith.addf %254, %253 : vector<2x32xf32>
    %256 = arith.divf %254, %255 : vector<2x32xf32>
    %257 = arith.mulf %248, %222 : vector<2x32xf32>
    %258 = arith.mulf %242, %250 : vector<2x32xf32>
    %259 = arith.addf %257, %258 : vector<2x32xf32>
    %260 = math.tanh %259 : vector<2x32xf32>
    %261 = arith.mulf %256, %260 : vector<2x32xf32>
    %c0_87 = arith.constant 0 : index
    %262 = arith.index_cast %231 : i32 to index
    %c0_88 = arith.constant 0 : index
    %c0_89 = arith.constant 0 : index
    %263 = vector.load %arg4[%c0_87, %262, %c0_88, %c0_89] : memref<1x8x2x32xf32, #tpu.memory_space<vmem>>, vector<1x1x2x32xf32>
    %264 = vector.shape_cast %263 : vector<1x1x2x32xf32> to vector<2x32xf32>
    %265 = vector.shape_cast %261 : vector<2x32xf32> to vector<1x1x2x32xf32>
    tpu.vector_store %arg4[%c0_87, %262, %c0_88, %c0_89], %265 {strides = array<i32>} : memref<1x8x2x32xf32, #tpu.memory_space<vmem>>, vector<1x1x2x32xf32>,
    %c7_i32_90 = arith.constant 7 : i32
    %c0_i32_91 = arith.constant 0 : i32
    %266 = arith.cmpi eq, %arg0, %c0_i32_91 : i32
    %c7_i32_92 = arith.constant 7 : i32
    %267 = arith.subi %c7_i32_92, %c7_i32_90 : i32
    %268 = arith.select %266, %c7_i32_90, %267 : i32
    %c0_93 = arith.constant 0 : index
    %269 = arith.index_cast %268 : i32 to index
    %c0_94 = arith.constant 0 : index
    %c0_95 = arith.constant 0 : index
    %270 = vector.load %arg2[%c0_93, %269, %c0_94, %c0_95] : memref<1x8x2x128xf32, #tpu.memory_space<vmem>>, vector<1x1x2x128xf32>
    %271 = vector.shape_cast %270 : vector<1x1x2x128xf32> to vector<2x128xf32>
    %cst_96 = arith.constant dense<0.000000e+00> : vector<2x128xf32>
    %272 = tpu.matmul %261, %4, %cst_96 {dimension_numbers = #tpu.dot_dimension_numbers<[1], [0], [0], [1], [0, 0, 1, 1], [], []>} : vector<2x32xf32>, vector<32x128xf32>, vector<2x128xf32> -> vector<2x128xf32>
    %273 = arith.addf %271, %272 : vector<2x128xf32>
    %274 = vector.extract_strided_slice %273 {offsets = [0, 0], sizes = [2, 32], strides = [1, 1]} : vector<2x128xf32> to vector<2x32xf32>
    %275 = arith.negf %274 : vector<2x32xf32>
    %276 = math.exp %275 : vector<2x32xf32>
    %cst_97 = arith.constant 1.000000e+00 : f32
    %277 = vector.broadcast %cst_97 : f32 to vector<2x32xf32>
    %278 = arith.addf %277, %276 : vector<2x32xf32>
    %279 = arith.divf %277, %278 : vector<2x32xf32>
    %280 = vector.extract_strided_slice %273 {offsets = [0, 32], sizes = [2, 32], strides = [1, 1]} : vector<2x128xf32> to vector<2x32xf32>
    %281 = arith.negf %280 : vector<2x32xf32>
    %282 = math.exp %281 : vector<2x32xf32>
    %cst_98 = arith.constant 1.000000e+00 : f32
    %283 = vector.broadcast %cst_98 : f32 to vector<2x32xf32>
    %284 = arith.addf %283, %282 : vector<2x32xf32>
    %285 = arith.divf %283, %284 : vector<2x32xf32>
    %286 = vector.extract_strided_slice %273 {offsets = [0, 64], sizes = [2, 32], strides = [1, 1]} : vector<2x128xf32> to vector<2x32xf32>
    %287 = math.tanh %286 : vector<2x32xf32>
    %288 = vector.extract_strided_slice %273 {offsets = [0, 96], sizes = [2, 32], strides = [1, 1]} : vector<2x128xf32> to vector<2x32xf32>
    %289 = arith.negf %288 : vector<2x32xf32>
    %290 = math.exp %289 : vector<2x32xf32>
    %cst_99 = arith.constant 1.000000e+00 : f32
    %291 = vector.broadcast %cst_99 : f32 to vector<2x32xf32>
    %292 = arith.addf %291, %290 : vector<2x32xf32>
    %293 = arith.divf %291, %292 : vector<2x32xf32>
    %294 = arith.mulf %285, %259 : vector<2x32xf32>
    %295 = arith.mulf %279, %287 : vector<2x32xf32>
    %296 = arith.addf %294, %295 : vector<2x32xf32>
    %297 = math.tanh %296 : vector<2x32xf32>
    %298 = arith.mulf %293, %297 : vector<2x32xf32>
    %c0_100 = arith.constant 0 : index
    %299 = arith.index_cast %268 : i32 to index
    %c0_101 = arith.constant 0 : index
    %c0_102 = arith.constant 0 : index
    %300 = vector.load %arg4[%c0_100, %299, %c0_101, %c0_102] : memref<1x8x2x32xf32, #tpu.memory_space<vmem>>, vector<1x1x2x32xf32>
    %301 = vector.shape_cast %300 : vector<1x1x2x32xf32> to vector<2x32xf32>
    %302 = vector.shape_cast %298 : vector<2x32xf32> to vector<1x1x2x32xf32>
    tpu.vector_store %arg4[%c0_100, %299, %c0_101, %c0_102], %302 {strides = array<i32>} : memref<1x8x2x32xf32, #tpu.memory_space<vmem>>, vector<1x1x2x32xf32>,
    %c8_i32 = arith.constant 8 : i32
    %c0_103 = arith.constant 0 : index
    %c0_104 = arith.constant 0 : index
    %303 = vector.load %arg5[%c0_103, %c0_104] : memref<2x32xf32, #tpu.memory_space<vmem>>, vector<2x32xf32>
    tpu.vector_store %arg5[%c0_103, %c0_104], %298 {strides = array<i32>} : memref<2x32xf32, #tpu.memory_space<vmem>>, vector<2x32xf32>,
    %c0_105 = arith.constant 0 : index
    %c0_106 = arith.constant 0 : index
    %304 = vector.load %arg6[%c0_105, %c0_106] : memref<2x32xf32, #tpu.memory_space<vmem>>, vector<2x32xf32>
    tpu.vector_store %arg6[%c0_105, %c0_106], %296 {strides = array<i32>} : memref<2x32xf32, #tpu.memory_space<vmem>>, vector<2x32xf32>,
    return
  }
  func.func @transform_0(%arg0: i32, %arg1: i32) -> (i32, i32, i32, i32) {
    %c1_i32 = arith.constant 1 : i32
    %0 = arith.subi %c1_i32, %arg0 : i32
    %1 = arith.muli %0, %arg1 : i32
    %c0_i32 = arith.constant 0 : i32
    %2 = arith.subi %c0_i32, %arg1 : i32
    %3 = arith.muli %arg0, %2 : i32
    %4 = arith.addi %1, %3 : i32
    %c0_i32_0 = arith.constant 0 : i32
    %c0_i32_1 = arith.constant 0 : i32
    %c0_i32_2 = arith.constant 0 : i32
    return %arg0, %4, %c0_i32_0, %c0_i32_1 : i32, i32, i32, i32
  }
  func.func @transform_1(%arg0: i32, %arg1: i32) -> (i32, i32, i32) {
    %c0_i32 = arith.constant 0 : i32
    %c0_i32_0 = arith.constant 0 : i32
    %c0_i32_1 = arith.constant 0 : i32
    return %arg0, %c0_i32, %c0_i32_0 : i32, i32, i32
  }
  func.func @transform_2(%arg0: i32, %arg1: i32) -> (i32, i32, i32, i32) {
    %c1_i32 = arith.constant 1 : i32
    %0 = arith.subi %c1_i32, %arg0 : i32
    %1 = arith.muli %0, %arg1 : i32
    %c0_i32 = arith.constant 0 : i32
    %2 = arith.subi %c0_i32, %arg1 : i32
    %3 = arith.muli %arg0, %2 : i32
    %4 = arith.addi %1, %3 : i32
    %c0_i32_0 = arith.constant 0 : i32
    %c0_i32_1 = arith.constant 0 : i32
    %c0_i32_2 = arith.constant 0 : i32
    return %arg0, %4, %c0_i32_0, %c0_i32_1 : i32, i32, i32, i32
  }
}

module attributes {stable_mosaic.version = 11 : i64} {
  func.func @_linear_tanh_kernel(%arg0: i32, %arg1: i32, %arg2: memref<2x16x32xf32, #tpu.memory_space<vmem>>, %arg3: memref<32x128xf32, #tpu.memory_space<vmem>>, %arg4: memref<32x128xf32, #tpu.memory_space<vmem>>, %arg5: memref<1x128xf32, #tpu.memory_space<vmem>>, %arg6: memref<16x128xf32, #tpu.memory_space<vmem>>) attributes {dimension_semantics = [#tpu.dimension_semantics<parallel>, #tpu.dimension_semantics<parallel>], iteration_bounds = array<i64: 1, 1>, scalar_prefetch = 0 : i64, scratch_operands = 0 : i64, tpu.core_type = #tpu.core_type<tc>, window_params = [{transform_indices = @transform_0, window_bounds = array<i64: 2, 16, 32>}, {transform_indices = @transform_1, window_bounds = array<i64: 32, 128>}, {transform_indices = @transform_2, window_bounds = array<i64: 32, 128>}, {transform_indices = @transform_3, window_bounds = array<i64: 1, 128>}, {transform_indices = @transform_4, window_bounds = array<i64: 16, 128>}]} {
    %c0 = arith.constant 0 : index
    %c0_0 = arith.constant 0 : index
    %c0_1 = arith.constant 0 : index
    %0 = vector.load %arg2[%c0, %c0_0, %c0_1] : memref<2x16x32xf32, #tpu.memory_space<vmem>>, vector<1x16x32xf32>
    %1 = vector.shape_cast %0 : vector<1x16x32xf32> to vector<16x32xf32>
    %c0_2 = arith.constant 0 : index
    %c0_3 = arith.constant 0 : index
    %2 = vector.load %arg3[%c0_2, %c0_3] : memref<32x128xf32, #tpu.memory_space<vmem>>, vector<32x128xf32>
    %cst = arith.constant dense<0.000000e+00> : vector<16x128xf32>
    %3 = tpu.matmul %1, %2, %cst {dimension_numbers = #tpu.dot_dimension_numbers<[1], [0], [0], [1], [0, 0, 1, 1], [], []>} : vector<16x32xf32>, vector<32x128xf32>, vector<16x128xf32> -> vector<16x128xf32>
    %c1 = arith.constant 1 : index
    %c0_4 = arith.constant 0 : index
    %c0_5 = arith.constant 0 : index
    %4 = vector.load %arg2[%c1, %c0_4, %c0_5] : memref<2x16x32xf32, #tpu.memory_space<vmem>>, vector<1x16x32xf32>
    %5 = vector.shape_cast %4 : vector<1x16x32xf32> to vector<16x32xf32>
    %c0_6 = arith.constant 0 : index
    %c0_7 = arith.constant 0 : index
    %6 = vector.load %arg4[%c0_6, %c0_7] : memref<32x128xf32, #tpu.memory_space<vmem>>, vector<32x128xf32>
    %cst_8 = arith.constant dense<0.000000e+00> : vector<16x128xf32>
    %7 = tpu.matmul %5, %6, %cst_8 {dimension_numbers = #tpu.dot_dimension_numbers<[1], [0], [0], [1], [0, 0, 1, 1], [], []>} : vector<16x32xf32>, vector<32x128xf32>, vector<16x128xf32> -> vector<16x128xf32>
    %8 = arith.addf %3, %7 : vector<16x128xf32>
    %c0_9 = arith.constant 0 : index
    %c0_10 = arith.constant 0 : index
    %9 = vector.load %arg5[%c0_9, %c0_10] : memref<1x128xf32, #tpu.memory_space<vmem>>, vector<1x128xf32>
    %10 = vector.broadcast %9 : vector<1x128xf32> to vector<16x128xf32>
    %11 = arith.addf %8, %10 : vector<16x128xf32>
    %12 = math.tanh %11 : vector<16x128xf32>
    %c0_11 = arith.constant 0 : index
    %c0_12 = arith.constant 0 : index
    %13 = vector.load %arg6[%c0_11, %c0_12] : memref<16x128xf32, #tpu.memory_space<vmem>>, vector<16x128xf32>
    tpu.vector_store %arg6[%c0_11, %c0_12], %12 {strides = array<i32>} : memref<16x128xf32, #tpu.memory_space<vmem>>, vector<16x128xf32>,
    return
  }
  func.func @transform_0(%arg0: i32, %arg1: i32) -> (i32, i32, i32) {
    %c0_i32 = arith.constant 0 : i32
    %c0_i32_0 = arith.constant 0 : i32
    %c0_i32_1 = arith.constant 0 : i32
    return %c0_i32, %arg0, %c0_i32_0 : i32, i32, i32
  }
  func.func @transform_1(%arg0: i32, %arg1: i32) -> (i32, i32) {
    %c0_i32 = arith.constant 0 : i32
    %c0_i32_0 = arith.constant 0 : i32
    return %c0_i32, %arg1 : i32, i32
  }
  func.func @transform_2(%arg0: i32, %arg1: i32) -> (i32, i32) {
    %c0_i32 = arith.constant 0 : i32
    %c0_i32_0 = arith.constant 0 : i32
    return %c0_i32, %arg1 : i32, i32
  }
  func.func @transform_3(%arg0: i32, %arg1: i32) -> (i32, i32) {
    %c0_i32 = arith.constant 0 : i32
    %c0_i32_0 = arith.constant 0 : i32
    return %c0_i32, %arg1 : i32, i32
  }
  func.func @transform_4(%arg0: i32, %arg1: i32) -> (i32, i32) {
    %c0_i32 = arith.constant 0 : i32
    return %arg0, %arg1 : i32, i32
  }
}

</mosaic_0001>

<bundles_post_ra>
// kernel: dpcl_forward.5
= control target key start
LH: loop header
LB: loop body
LE: loop exit
PB: predicated region body
PF: predicated region fallthrough
CT: control target
= control target key end

     0   :  { %8 = vsyncpa [#allocation3], 0  ;;  %s757_s0 = inlined_call_operand.vmem [shape: f32[16,16], index: 0, kind: input, shape index: {}]   ;;  %s758_s1 = inlined_call_operand.vmem [shape: f32[2,16,128], index: 1, kind: input, shape index: {}]   ;;  %s759_s2 = inlined_call_operand.hbm [shape: f32[2,1,128], index: 2, kind: input, shape index: {}]   ;;  %s760_s3 = inlined_call_operand.vmem [shape: f32[2,16,128], index: 3, kind: output, shape index: {}]  }
   0x1   :  { %10 = vsyncpa [#allocation3 + $0x1], 0  ;;  %s648_s12 = smov 0   ;;  %s650_s13 = smov 0  }
   0x2   :  { %s652_s14 = smov 0   ;;  %s654_s15 = smov 0  }
   0x3   :  { %s656_s16 = smov 0   ;;  %s658_s17 = smov 0  }
   0x4 LB: > { %s463_s18 = sadd.s32 4294967295, %s625_s17   ;;  %s28_s19 = sadd.s32 1, %s621_s16  ;;  %s625_s17 = sphi %s658_s17, %s16_s17   ;;  %s621_s16 = sphi %s656_s16, %s768_s16   ;;  %s617_s15 = sphi %s654_s15, %s767_s15   ;;  %s613_s14 = sphi %s652_s14, %s766_s14   ;;  %s609_s13 = sphi %s650_s13, %s765_s13   ;;  %s605_s12 = sphi %s648_s12, %s764_s12  }
   0x5   : > { %p30_p0 = scmp.ge.s32.totalorder %s28_s19, 2  ;;  %s87_s20 = sadd.s32 1, %s613_s14 }
   0x6   : > { %p94_p1 = scmp.ne.s32.totalorder %s613_s14, %s609_s13  ;;  %p95_p2 = scmp.eq.s32.totalorder %s625_s17, 0 }
   0x7   : > { %s770_s19 = smov (%p30_p0, %s28_s19), 0  ;;  %p100_p4 = scmp.ne.s32.totalorder %s609_s13, %s605_s12 }
   0x8   : > { %p684_p3 = por %p95_p2, %p94_p1  ;;  %s84_s22 = ssub.s32 %s621_s16, %s770_s19 }
   0x9   : > { %p101_p5 = scmp.eq.s32.totalorder %s463_s18, 0  ;;  %p85_p6 = scmp.eq.s32.totalorder %s84_s22, 0 }
   0xa   : > { %p498_p8 = scmp.lt.s32.totalorder %s625_s17, 2  ;;  %s169_s25 = sand.u32 1, %s613_s14  }
   0xb   : > { %p691_p7 = por %p101_p5, %p100_p4  ;;  %s468_s26 = sshll.u32 %s621_s16, 4 }
   0xc   : > { %s697_s24 = scalar_select %p85_p6, %s613_s14, %s87_s20  }
   0xd   : > { %s177_s29 = scalar_lea.hbm %s759_s2, %s468_s26  ;;  %s172_s30 = scalar_lea.vmem [#allocation2], %s169_s25 }
   0xe   : > { %s179_s4 = sshll.u32 %s172_s30, 4  ;;  %p706_p9 = pnand %p498_p8, %p684_p3  ;;  %s180_s4 = int_to_ptr.vmem [resolvable:$true] %s179_s4 }
   0xf   : > { %p469_p10 = scmp.ge.s32.totalorder %s625_s17, 1  ;;  %p184_p11 = scmp.lt.s32.totalorder %s625_s17, 3 }
  0x10   : > { %s170_s6 = scalar_lea.sflag [#allocation3], %s169_s25  ;;  %p549_p12 = pneg %p706_p9 }
  0x11   : > { %s560_s7 = scalar_lea.vmem %s180_s4, 16  ;;  %s627_s8 = smov [#allocation2]  }
  0x12   : > { %p561_p13 = scmp.ne.s32.totalorder %s180_s4, %s560_s7  ;;  %s565_s9 = sshll.u32 %s627_s8, 4  ;;  %s566_s9 = int_to_ptr.vmem [resolvable:$false] %s565_s9 }
  0x13   : > { %s567_s10 = scalar_lea.vmem %s566_s9, 32  ;;  %p568_p2 = scmp.lt.s32.totalorder %s180_s4, %s566_s9 }
  0x14   : > { %p563_p0 = pnand %p561_p13, %p549_p12  ;;  %p569_p4 = scmp.lt.s32.totalorder %s567_s10, %s560_s7 }
  0x16   : > { %p564_p1 = pneg %p563_p0  ;;  %p570_p3 = por %p569_p4, %p568_p2 }
  0x18   : > { %p571_p5 = pnand %p570_p3, %p564_p1 }
  0x1a   : > { %574 = shalt.err (!%p571_p5)
}
  0x1b   : > { %497 = dma.hbm_to_vmem [thread:$0]  (!%p706_p9), %s177_s29, 16, %s180_s4, %s170_s6  }
  0x1c   : > { %p185_p6 = pnand %p469_p10, %p184_p11 }
  0x1d   : > { %s190_s11 = sand.u32 (!%p185_p6), 1, %s609_s13  }
  0x1e   : > { %188 = sbr.rel (%p185_p6) target bundleno = 244 (0xf4), region = 32  ;;  %s191_s12 = scalar_lea.sflag (!%p185_p6), [#allocation3], %s190_s11 }
  0x1f   : > { %s193_s18 = scalar_lea.vmem (!%p185_p6), [#allocation2], %s190_s11 }
  0x23   : > { %600 = dma.done.wait (%p691_p7), %s191_s12, 16  }
  0x24   : > { %602 = vsyncadd (%p691_p7), %s191_s12, 4294967280  ;;  %p235_p8 = scmp.lt.s32.totalorder %s617_s15, 1  ;;  %vm255_vm0 = vcmask 130048   ;;  %v251_v2 = vld [vmem:[%s757_s0] sm:$0xff]  ;;  %v252_v3 = vld [vmem:[%s757_s0 + $0x8] sm:$0xff] }
  0x25   : > { %489 = vmatprep.mubr.msk.f32.mxu0 %vm255_vm0, %v251_v2  ;;  %v476_v4 = vld [vmem:[%s193_s18] ss:$0 sm:$0xff] }
  0x26   : > { %s772_s15 = smov (!%p235_p8, %s617_s15), 1 }
  0x27   : > { %s479_s20 = sshll.u32 %s772_s15, 4 }
  0x28   : > { %s239_s25 = scalar_lea.vmem %s758_s1, %s479_s20  ;;  %s248_s30 = scalar_lea.vmem %s760_s3, %s479_s20 }
  0x29   : > { %v254_v0 = vld [vmem:[%s239_s25 + $0x8] sm:$0xff]  ;;  %v253_v1 = vld [vmem:[%s239_s25] sm:$0xff] }
  0x2a   : > { %485 = vmatprep.subr.mxu0 %v254_v0 }
  0x2b   : > { %486 = vmatpush3.msra.mxu0 %v254_v0 }
  0x2c   : > { %487 = vmatprep.subr.mxu0 %v253_v1 }
  0x2d   : > { %488 = vmatpush3.msra.mxu0 %v253_v1 }
  0x2e   : > { %490 = vmatmul.mubr.msk.f32.vlgmr.msra.gmra.mxu0 %vm255_vm0, %v252_v3 }
  0xee   : > { %v491_v5 = vpop.f32.mrf.mxu0 }
  0xef   : > { %v344_v6 = vadd.f32 %v491_v5, %v476_v4 }
  0xf0   : > { %v328_v7 = vpop.f32.mrf.mxu0 }
  0xf1   : > { %346 = vst [vmem:[%s248_s30 + $0x8] sm:$0xff] %v344_v6  ;;  %v343_v8 = vadd.f32 %v476_v4, %v328_v7 }
  0xf3   : > { %345 = vst [vmem:[%s248_s30] sm:$0xff] %v343_v8 }
  0xf4 PF: > { %s16_s17 = sadd.s32 1, %s625_s17   ;;  %s764_s12 = smov %s609_s13 }
  0xf5   : > { %p13_p7 = scmp.ge.s32.totalorder %s16_s17, 4   ;;  %s765_s13 = smov %s613_s14 }
  0xf6   : > { %s766_s14 = smov %s697_s24  ;;  %s767_s15 = smov %s621_s16 }
  0xf7   : > { %s768_s16 = smov %s770_s19  ;;  %15 = sbr.rel (!%p13_p7) target bundleno = 4 (0x4), region = 78 }
  0xfc   :  { %377 = vsyncpa [#allocation3], 1 }
  0xfd   :  { %379 = vsyncpa [#allocation3 + $0x1], 1 }

// kernel: dpcl_forward.7
= control target key start
LH: loop header
LB: loop body
LE: loop exit
PB: predicated region body
PF: predicated region fallthrough
CT: control target
= control target key end

     0   :  { %s789_s18 = smov 0   ;;  %s791_s19 = smov 0   ;;  %s849_s0 = inlined_call_operand.vmem [shape: f32[2,16,32], index: 0, kind: input, shape index: {}, may-alias: {0,1}]   ;;  %s850_s1 = inlined_call_operand.vmem [shape: f32[2,16,32], index: 1, kind: input, shape index: {}, may-alias: {0,1}]   ;;  %s851_s2 = inlined_call_operand.vmem [shape: f32[2,32,128], index: 2, kind: input, shape index: {}]   ;;  %s852_s3 = inlined_call_operand.vmem [shape: f32[2,32,128], index: 3, kind: input, shape index: {}]   ;;  %s853_s4 = inlined_call_operand.vmem [shape: f32[2,1,128], index: 4, kind: input, shape index: {}]   ;;  %s854_s5 = inlined_call_operand.vmem [shape: f32[2,16,128], index: 5, kind: output, shape index: {}]  }
   0x1   :  { %s793_s20 = smov 0  }
   0x2 LB: > { %s27_s21 = sadd.s32 1, %s753_s19  ;;  %p658_p0 = scmp.ge.s32.totalorder %s757_s20, 1  ;;  %s757_s20 = sphi %s793_s20, %s15_s20   ;;  %s753_s19 = sphi %s791_s19, %s856_s19   ;;  %s749_s18 = sphi %s789_s18, %s855_s18  }
   0x3   : > { %p29_p1 = scmp.ge.s32.totalorder %s27_s21, 2  ;;  %p242_p2 = scmp.lt.s32.totalorder %s757_s20, 3 }
   0x5   : > { %s858_s21 = smov (%p29_p1, %s27_s21), 0  ;;  %p243_p3 = pnand %p658_p0, %p242_p2 }
   0x6   : > { %p306_p4 = scmp.lt.s32.totalorder (!%p243_p3), %s749_s18, 1 }
   0x7   : > { %246 = sbr.rel (%p243_p3) target bundleno = 224 (0xe0), region = 40 }
   0xc   : > { %v330_v0 = vld [vmem:[%s849_s0] sm:$0xff]  ;;  %vm336_vm0 = vcmask 261120   ;;  %v668_v1 = vld [vmem:[%s850_s1 + $0x10] sm:$0xff]  ;;  %s860_s18 = smov (!%p306_p4, %s749_s18), 1  ;;  %v331_v10 = vld [vmem:[%s849_s0 + $0x8] sm:$0xff] }
   0xd   : > { %697 = vmatprep.mubr.msk.f32.mxu0 %vm336_vm0, %v330_v0  ;;  %708 = vmatprep.mubr.msk.f32.mxu1 %vm336_vm0, %v668_v1  ;;  %s674_s26 = sshll.u32 %s860_s18, 5  ;;  %v669_v11 = vld [vmem:[%s850_s1 + $0x18] sm:$0xff]  ;;  %s318_s14 = scalar_lea.vmem %s853_s4, %s860_s18 }
   0xe   : > { %s310_s29 = scalar_lea.vmem %s851_s2, %s674_s26  ;;  %s315_s7 = scalar_lea.vmem %s852_s3, %s674_s26  ;;  %v667_v12 = vld [vmem:[%s318_s14] ss:$0 sm:$0xff] }
   0xf   : > { %v335_v2 = vld [vmem:[%s310_s29 + $0x18] sm:$0xff]  ;;  %v334_v4 = vld [vmem:[%s310_s29 + $0x10] sm:$0xff]  ;;  %v333_v6 = vld [vmem:[%s310_s29 + $0x8] sm:$0xff]  ;;  %s676_s15 = sshll.u32 %s860_s18, 4 }
  0x10   : > { %v431_v3 = vld [vmem:[%s315_s7 + $0x18] sm:$0xff]  ;;  %689 = vmatprep.subr.mxu0 %v335_v2  ;;  %v430_v5 = vld [vmem:[%s315_s7 + $0x10] sm:$0xff]  ;;  %v429_v7 = vld [vmem:[%s315_s7 + $0x8] sm:$0xff]  ;;  %s327_s22 = scalar_lea.vmem %s854_s5, %s676_s15 }
  0x11   : > { %700 = vmatprep.subr.mxu1 %v431_v3  ;;  %690 = vmatpush3.msra.mxu0 %v335_v2  ;;  %v332_v8 = vld [vmem:[%s310_s29] sm:$0xff] }
  0x12   : > { %701 = vmatpush3.msra.mxu1 %v431_v3  ;;  %691 = vmatprep.subr.mxu0 %v334_v4  ;;  %v428_v9 = vld [vmem:[%s315_s7] sm:$0xff] }
  0x13   : > { %702 = vmatprep.subr.mxu1 %v430_v5  ;;  %692 = vmatpush3.msra.mxu0 %v334_v4 }
  0x14   : > { %703 = vmatpush3.msra.mxu1 %v430_v5  ;;  %693 = vmatprep.subr.mxu0 %v333_v6 }
  0x15   : > { %704 = vmatprep.subr.mxu1 %v429_v7  ;;  %694 = vmatpush3.msra.mxu0 %v333_v6 }
  0x16   : > { %705 = vmatpush3.msra.mxu1 %v429_v7  ;;  %695 = vmatprep.subr.mxu0 %v332_v8 }
  0x17   : > { %706 = vmatprep.subr.mxu1 %v428_v9  ;;  %696 = vmatpush3.msra.mxu0 %v332_v8 }
  0x18   : > { %707 = vmatpush3.msra.mxu1 %v428_v9  ;;  %698 = vmatmul.mubr.msk.f32.vlgmr.msra.gmra.mxu0 %vm336_vm0, %v331_v10 }
  0x19   : > { %709 = vmatmul.mubr.msk.f32.vlgmr.msra.gmra.mxu1 %vm336_vm0, %v669_v11 }
  0xd8   : > { %v699_v13 = vpop.f32.mrf.mxu0 }
  0xd9   : > { %v710_v14 = vpop.f32.mrf.mxu1  ;;  %v425_v15 = vadd.f32 %v699_v13, %v667_v12 }
  0xda   : > { %v409_v16 = vpop.f32.mrf.mxu0 }
  0xdb   : > { %v514_v17 = vadd.f32 %v710_v14, %v425_v15  ;;  %v424_v18 = vadd.f32 %v667_v12, %v409_v16  ;;  %v504_v19 = vpop.f32.mrf.mxu1 }
  0xdd   : > { %516 = vst [vmem:[%s327_s22 + $0x8] sm:$0xff] %v514_v17  ;;  %v513_v20 = vadd.f32 %v504_v19, %v424_v18 }
  0xdf   : > { %515 = vst [vmem:[%s327_s22] sm:$0xff] %v513_v20 }
  0xe0 PF: > { %s15_s20 = sadd.s32 1, %s757_s20   ;;  %s855_s18 = smov %s753_s19 }
  0xe1   : > { %p12_p5 = scmp.ge.s32.totalorder %s15_s20, 4   ;;  %s856_s19 = smov %s858_s21 }
  0xe3   :  { %14 = sbr.rel (!%p12_p5) target bundleno = 2 (0x2), region = 82 }

// kernel: dpcl_forward.9
= control target key start
LH: loop header
LB: loop body
LE: loop exit
PB: predicated region body
PF: predicated region fallthrough
CT: control target
= control target key end

     0   :  { %vm30_vm0 = vcmask 261120   ;;  %s325_s2 = inlined_call_operand.vmem [shape: f32[32,128], index: 2, kind: input, shape index: {}]   ;;  %s326_s1 = inlined_call_operand.vmem [shape: f32[32,128], index: 1, kind: input, shape index: {}]   ;;  %s327_s0 = inlined_call_operand.vmem [shape: f32[2,16,32], index: 0, kind: input, shape index: {}]   ;;  %s328_s3 = inlined_call_operand.vmem [shape: f32[1,128], index: 3, kind: input, shape index: {}]   ;;  %s329_s4 = inlined_call_operand.vmem [shape: f32[16,128], index: 4, kind: output, shape index: {}]  }
   0x1   :  { %v29_v0 = vld [vmem:[%s325_s2 + $0x18] sm:$0xff]  ;;  %v28_v2 = vld [vmem:[%s325_s2 + $0x10] sm:$0xff]  ;;  %v27_v4 = vld [vmem:[%s325_s2 + $0x8] sm:$0xff] }
   0x2   :  { %v22_v1 = vld [vmem:[%s326_s1 + $0x18] sm:$0xff]  ;;  %229 = vmatprep.subr.mxu0 %v29_v0  ;;  %v21_v3 = vld [vmem:[%s326_s1 + $0x10] sm:$0xff]  ;;  %v20_v5 = vld [vmem:[%s326_s1 + $0x8] sm:$0xff] }
   0x3   :  { %240 = vmatprep.subr.mxu1 %v22_v1  ;;  %230 = vmatpush3.msra.mxu0 %v29_v0  ;;  %v26_v6 = vld [vmem:[%s325_s2] sm:$0xff]  ;;  %v210_v8 = vld [vmem:[%s327_s0 + $0x10] sm:$0xff]  ;;  %v211_v10 = vld [vmem:[%s327_s0 + $0x18] sm:$0xff] }
   0x4   :  { %241 = vmatpush3.msra.mxu1 %v22_v1  ;;  %231 = vmatprep.subr.mxu0 %v28_v2  ;;  %v19_v7 = vld [vmem:[%s326_s1] sm:$0xff]  ;;  %v18_v11 = vld [vmem:[%s327_s0 + $0x8] sm:$0xff] }
   0x5   :  { %242 = vmatprep.subr.mxu1 %v21_v3  ;;  %232 = vmatpush3.msra.mxu0 %v28_v2  ;;  %v17_v9 = vld [vmem:[%s327_s0] sm:$0xff] }
   0x6   :  { %243 = vmatpush3.msra.mxu1 %v21_v3  ;;  %233 = vmatprep.subr.mxu0 %v27_v4  ;;  %v216_v14 = vld [vmem:[%s328_s3] ss:$0 sm:$0xff] }
   0x7   :  { %244 = vmatprep.subr.mxu1 %v20_v5  ;;  %234 = vmatpush3.msra.mxu0 %v27_v4 }
   0x8   :  { %245 = vmatpush3.msra.mxu1 %v20_v5  ;;  %235 = vmatprep.subr.mxu0 %v26_v6 }
   0x9   :  { %246 = vmatprep.subr.mxu1 %v19_v7  ;;  %236 = vmatpush3.msra.mxu0 %v26_v6 }
   0xa   :  { %237 = vmatprep.mubr.msk.f32.mxu0 %vm30_vm0, %v210_v8  ;;  %247 = vmatpush3.msra.mxu1 %v19_v7 }
   0xb   :  { %248 = vmatprep.mubr.msk.f32.mxu1 %vm30_vm0, %v17_v9  ;;  %238 = vmatmul.mubr.msk.f32.vlgmr.msra.gmra.mxu0 %vm30_vm0, %v211_v10 }
   0xc   :  { %249 = vmatmul.mubr.msk.f32.vlgmr.msra.gmra.mxu1 %vm30_vm0, %v18_v11 }
  0xcb   :  { %v239_v12 = vpop.f32.mrf.mxu0 }
  0xcc   :  { %v250_v13 = vpop.f32.mrf.mxu1 }
  0xcd   :  { %v190_v15 = vadd.f32 %v250_v13, %v239_v12  ;;  %v103_v16 = vpop.f32.mrf.mxu0 }
  0xce   :  { %v184_v17 = vpop.f32.mrf.mxu1 }
  0xcf   :  { %v201_v18 = vadd.f32 %v216_v14, %v190_v15  ;;  %v185_v19 = vadd.f32 %v184_v17, %v103_v16 }
  0xd1   :  { %251 = vtanh.f32 %v201_v18  ;;  %v200_v20 = vadd.f32 %v216_v14, %v185_v19 }
  0xd3   :  { %253 = vtanh.f32 %v200_v20 }
  0xde   :  { %v252_v21 = vpop.eup %251 }
  0xdf   :  { %205 = vst [vmem:[%s329_s4 + $0x8] sm:$0xff] %v252_v21 }
  0xe0   :  { %v254_v22 = vpop.eup %253 }
  0xe1   :  { %204 = vst [vmem:[%s329_s4] sm:$0xff] %v254_v22 }

// kernel: dpcl_forward.6
= control target key start
LH: loop header
LB: loop body
LE: loop exit
PB: predicated region body
PF: predicated region fallthrough
CT: control target
= control target key end

     0   :  { %s1597_s9 = smov 0   ;;  %s1599_s10 = smov 0   ;;  %s1857_s0 = inlined_call_operand.vmem [shape: f32[2,8,2,128], index: 0, kind: input, shape index: {}]   ;;  %s1858_s1 = inlined_call_operand.vmem [shape: f32[2,32,128], index: 1, kind: input, shape index: {}]   ;;  %s1859_s2 = inlined_call_operand.vmem [shape: f32[2,8,2,32], index: 2, kind: output, shape index: {}]  }
   0x1   :  { %s1601_s11 = smov 0  }
   0x2 LB: > { %s24_s12 = sadd.s32 1, %s1571_s10  ;;  %p1296_p0 = scmp.ge.s32.totalorder %s1575_s11, 1  ;;  %s1575_s11 = sphi %s1601_s11, %s12_s11   ;;  %s1571_s10 = sphi %s1599_s10, %s1861_s10   ;;  %s1567_s9 = sphi %s1597_s9, %s1860_s9  }
   0x3   : > { %p26_p1 = scmp.ge.s32.totalorder %s24_s12, 2  ;;  %p173_p2 = scmp.lt.s32.totalorder %s1575_s11, 3 }
   0x5   : > { %s1863_s12 = smov (%p26_p1, %s24_s12), 0  ;;  %p174_p3 = pnand %p1296_p0, %p173_p2 }
   0x6   : > { %p224_p4 = scmp.lt.s32.totalorder (!%p174_p3), %s1567_s9, 1  ;;  %p276_p5 = scmp.eq.s32.totalorder (!%p174_p3), %s1567_s9, 0 }
   0x7   : > { %177 = sbr.rel (%p174_p3) target bundleno = 5537 (0x15a1), region = 28  ;;  %s1579_s25 = smov (!%p174_p3), 64  }
   0x8   : > { %s1580_s26 = smov (!%p174_p3), 32  }
   0xc   : > { %vm267_vm0 = vcmask 254976   ;;  %v1577_v0 = vmov 0.0   ;;  %vm1578_vm1 = vmmov 0   ;;  %s1626_s13 = scalar_select %p224_p4, %s1567_s9, 1  ;;  %vm281_vm2 = vcmask 261120  }
   0xd   : > { %1372 = vmatprep.subr.mxu0 %v1577_v0  ;;  %1380 = vmatprep.mubr.msk.f32.mxu0 %vm1578_vm1, %v1577_v0  ;;  %268 = vst.msk [vmem:[#allocation2] sm:$0x3] %vm267_vm0, %v1577_v0  ;;  %269 = vst.msk [vmem:[#allocation3] sm:$0x3] %vm267_vm0, %v1577_v0  ;;  %s1673_s18 = scalar_select %p276_p5, 0, 7 }
   0xe   : > { %1383 = vmatprep.subr.mxu1 %v1577_v0  ;;  %1391 = vmatprep.mubr.msk.f32.mxu1 %vm1578_vm1, %v1577_v0  ;;  %s1330_s14 = sshll.u32 %s1626_s13, 5  ;;  %s1329_s19 = sshll.u32 %s1626_s13, 4 }
   0xf   : > { %s242_s17 = scalar_lea.vmem %s1858_s1, %s1330_s14  ;;  %s1681_s22 = scalar_lea.vmem %s1857_s0, %s1329_s19 }
  0x10   : > { %v1635_v1 = vld [vmem:[%s242_s17 + $0x18] sm:$0xff]  ;;  %v1637_v2 = vld [vmem:[%s242_s17 + $0x10] sm:$0xff]  ;;  %v1642_v3 = vld [vmem:[%s242_s17 + $0x8] sm:$0xff]  ;;  %s1303_s23 = sshll.u32 %s1673_s18, 1  ;;  %s1697_s29 = scalar_lea.vmem %s1859_s2, %s1329_s19 }
  0x11   : > { %1373 = vmatpush3.msra.mxu0 %v1635_v1  ;;  %1384 = vmatpush3.msra.mxu1 %v1635_v1  ;;  %v1648_v4 = vld [vmem:[%s242_s17] sm:$0xff]  ;;  %s279_s24 = scalar_lea.vmem %s1681_s22, %s1303_s23  ;;  %s388_s30 = scalar_lea.vmem %s1697_s29, %s1303_s23 }
  0x12   : > { %1374 = vmatprep.subr.mxu0 %v1577_v0  ;;  %1385 = vmatprep.subr.mxu1 %v1577_v0  ;;  %v280_v6 = vld [vmem:[%s279_s24] sm:$0x3]  ;;  %s1716_s3 = scalar_select %p276_p5, 1, 6 }
  0x13   : > { %1375 = vmatpush3.msra.mxu0 %v1637_v2  ;;  %1386 = vmatpush3.msra.mxu1 %v1637_v2  ;;  %s1739_s7 = scalar_select %p276_p5, 2, 5 }
  0x14   : > { %1376 = vmatprep.subr.mxu0 %v1577_v0  ;;  %1387 = vmatprep.subr.mxu1 %v1577_v0  ;;  %v274_v5 = vld [vmem:[#allocation2] sm:$0x3]  ;;  %v275_v11 = vld [vmem:[#allocation3] sm:$0x3]  ;;  %s1306_s4 = sshll.u32 %s1716_s3, 1  ;;  %s1581_s9 = smov 96  }
  0x15   : > { %1377 = vmatpush3.msra.mxu0 %v1642_v3  ;;  %1388 = vmatpush3.msra.mxu1 %v1642_v3  ;;  %s393_s5 = scalar_lea.vmem %s1681_s22, %s1306_s4  ;;  %s496_s6 = scalar_lea.vmem %s1697_s29, %s1306_s4 }
  0x16   : > { %1378 = vmatprep.subr.mxu0 %v1577_v0  ;;  %1389 = vmatprep.subr.mxu1 %v1577_v0  ;;  %v394_v26 = vld [vmem:[%s393_s5] sm:$0x3]  ;;  %s1309_s8 = sshll.u32 %s1739_s7, 1 }
  0x17   : > { %1379 = vmatpush3.msra.mxu0 %v1648_v4  ;;  %1390 = vmatpush3.msra.mxu1 %v1648_v4  ;;  %s500_s13 = scalar_lea.vmem %s1681_s22, %s1309_s8  ;;  %s603_s14 = scalar_lea.vmem %s1697_s29, %s1309_s8 }
  0x18   : > { %1381 = vmatmul.mubr.msk.f32.vlgmr.msra.gmra.mxu0 %vm281_vm2, %v274_v5  ;;  %1394 = vmatprep.subr.mxu0 %v1577_v0  ;;  %v501_v44 = vld [vmem:[%s500_s13] sm:$0x3]  ;;  %s1762_s15 = scalar_select %p276_p5, 3, 4 }
  0x19   : > { %1395 = vmatpush3.msra.mxu0 %v1635_v1  ;;  %1402 = vmatprep.mubr.msk.f32.mxu0 %vm1578_vm1, %v1577_v0  ;;  %s1784_s19 = scalar_select %p276_p5, 4, 3 }
  0x1a   : > { %1396 = vmatprep.subr.mxu0 %v1577_v0  ;;  %1405 = vmatprep.subr.mxu1 %v1577_v0  ;;  %s1312_s16 = sshll.u32 %s1762_s15, 1 }
  0x1b   : > { %1397 = vmatpush3.msra.mxu0 %v1637_v2  ;;  %s607_s17 = scalar_lea.vmem %s1681_s22, %s1312_s16  ;;  %s710_s18 = scalar_lea.vmem %s1697_s29, %s1312_s16 }
  0x1c   : > { %1398 = vmatprep.subr.mxu0 %v1577_v0  ;;  %v608_v62 = vld [vmem:[%s607_s17] sm:$0x3]  ;;  %s1315_s20 = sshll.u32 %s1784_s19, 1 }
  0x1d   : > { %1399 = vmatpush3.msra.mxu0 %v1642_v3  ;;  %s714_s21 = scalar_lea.vmem %s1681_s22, %s1315_s20  ;;  %s817_s23 = scalar_lea.vmem %s1697_s29, %s1315_s20 }
  0x1e   : > { %1400 = vmatprep.subr.mxu0 %v1577_v0  ;;  %s1806_s24 = scalar_select %p276_p5, 5, 2 }
  0x1f   : > { %1401 = vmatpush3.msra.mxu0 %v1648_v4  ;;  %s1819_s3 = scalar_select %p276_p5, 6, 1 }
  0x20   : > { %1416 = vmatprep.subr.mxu0 %v1577_v0  ;;  %s1318_s27 = sshll.u32 %s1806_s24, 1 }
  0x21   : > { %s821_s28 = scalar_lea.vmem %s1681_s22, %s1318_s27  ;;  %s1321_s4 = sshll.u32 %s1819_s3, 1 }
  0x22   : > { %s928_s5 = scalar_lea.vmem %s1681_s22, %s1321_s4 }
  0x23   : > { %s1832_s7 = scalar_select %p276_p5, 7, 0 }
  0x25   : > { %s1324_s8 = sshll.u32 %s1832_s7, 1 }
  0x26   : > { %s1035_s13 = scalar_lea.vmem %s1681_s22, %s1324_s8  ;;  %s1138_s22 = scalar_lea.vmem %s1697_s29, %s1324_s8 }
  0xd8   : > { %v351_v7 = vpop.f32.mrf.mxu0 }
  0xd9   : > { %v355_v8 = vadd.f32 %v351_v7, %v280_v6 }
  0xda   : > { %v1382_v9 = vpop.f32.mrf.mxu0 }
  0xdb   : > { %1489 = vtanh.f32 %v355_v8  ;;  %v1305_v12 = vmul.f32 -1.442695, %v355_v8 }
  0xdd   : > { %1491 = vpow2.f32 %v1305_v12 }
  0xe8   : > { %v1490_v10 = vpop.eup %1489 }
  0xe9   : > { %369 = vrot.lane.b32.xlu0 %v1490_v10, %s1579_s25 }
  0xea   : > { %v1492_v13 = vpop.eup %1491 }
  0xeb   : > { %v359_v14 = vadd.f32 1.0, %v1492_v13 }
  0xed   : > { %364 = vrot.lane.b32.xlu0 %v275_v11, %s1580_s26  ;;  %1493 = vrcp.f32 %v359_v14 }
  0xfa   : > { %v1494_v15 = vpop.eup %1493 }
 0x15b   : > { %v370_v16 = vpop.permute.xlu0 %369 }
 0x15c   : > { %v372_v17 = vmul.f32 %v1494_v15, %v370_v16 }
 0x15e   : > { %374 = vrot.lane.b32.xlu1 %v372_v17, %s1580_s26 }
 0x15f   : > { %v365_v18 = vpop.permute.xlu0 %364 }
 0x160   : > { %v367_v19 = vmul.f32 %v1494_v15, %v365_v18 }
 0x1d0   : > { %v375_v20 = vpop.permute.xlu1 %374 }
 0x1d1   : > { %v377_v21 = vadd.f32 %v375_v20, %v367_v19 }
 0x1d3   : > { %1495 = vtanh.f32 %v377_v21 }
 0x1e0   : > { %v1496_v22 = vpop.eup %1495 }
 0x1e1   : > { %380 = vrot.lane.b32.xlu1 %v1496_v22, %s1579_s25 }
 0x253   : > { %v381_v23 = vpop.permute.xlu1 %380 }
 0x254   : > { %v383_v24 = vmul.f32 %v1494_v15, %v381_v23 }
 0x256   : > { %385 = vrot.lane.b32.xlu0 %v383_v24, %s1580_s26 }
 0x2c8   : > { %v386_v25 = vpop.permute.xlu0 %385 }
 0x2c9   : > { %390 = vst.msk [vmem:[%s388_s30] sm:$0x3] %vm267_vm0, %v386_v25  ;;  %1392 = vmatmul.mubr.msk.f32.vlgmr.msra.gmra.mxu1 %vm281_vm2, %v386_v25  ;;  %s924_s30 = scalar_lea.vmem %s1697_s29, %s1318_s27 }
 0x2ca   : > { %1406 = vmatpush3.msra.mxu1 %v1635_v1  ;;  %1413 = vmatprep.mubr.msk.f32.mxu1 %vm1578_vm1, %v1577_v0 }
 0x2cb   : > { %1407 = vmatprep.subr.mxu1 %v1577_v0 }
 0x2cc   : > { %1408 = vmatpush3.msra.mxu1 %v1637_v2 }
 0x2cd   : > { %1409 = vmatprep.subr.mxu1 %v1577_v0 }
 0x2ce   : > { %1410 = vmatpush3.msra.mxu1 %v1642_v3 }
 0x2cf   : > { %1411 = vmatprep.subr.mxu1 %v1577_v0 }
 0x2d0   : > { %1412 = vmatpush3.msra.mxu1 %v1648_v4 }
 0x2d1   : > { %1427 = vmatprep.subr.mxu1 %v1577_v0 }
 0x389   : > { %v463_v27 = vpop.f32.mrf.mxu1 }
 0x38a   : > { %v467_v28 = vadd.f32 %v463_v27, %v394_v26 }
 0x38b   : > { %v1393_v29 = vpop.f32.mrf.mxu1 }
 0x38c   : > { %1497 = vtanh.f32 %v467_v28  ;;  %v1308_v31 = vmul.f32 -1.442695, %v467_v28 }
 0x38e   : > { %1499 = vpow2.f32 %v1308_v31 }
 0x399   : > { %v1498_v30 = vpop.eup %1497 }
 0x39a   : > { %477 = vrot.lane.b32.xlu1 %v1498_v30, %s1579_s25 }
 0x39b   : > { %v1500_v32 = vpop.eup %1499 }
 0x39c   : > { %v471_v33 = vadd.f32 1.0, %v1500_v32 }
 0x39e   : > { %1501 = vrcp.f32 %v471_v33 }
 0x3ab   : > { %v1502_v34 = vpop.eup %1501 }
 0x3ac   : > { %v475_v37 = vmul.f32 %v1502_v34, %v377_v21  ;;  %v715_v21 = vld [vmem:[%s714_s21] sm:$0x3] }
 0x40c   : > { %v478_v35 = vpop.permute.xlu1 %477 }
 0x40d   : > { %v480_v36 = vmul.f32 %v1502_v34, %v478_v35 }
 0x40f   : > { %482 = vrot.lane.b32.xlu0 %v480_v36, %s1580_s26 }
 0x481   : > { %v483_v38 = vpop.permute.xlu0 %482 }
 0x482   : > { %v485_v39 = vadd.f32 %v483_v38, %v475_v37 }
 0x484   : > { %1503 = vtanh.f32 %v485_v39 }
 0x491   : > { %v1504_v40 = vpop.eup %1503 }
 0x492   : > { %488 = vrot.lane.b32.xlu1 %v1504_v40, %s1579_s25 }
 0x504   : > { %v489_v41 = vpop.permute.xlu1 %488 }
 0x505   : > { %v491_v42 = vmul.f32 %v1502_v34, %v489_v41 }
 0x507   : > { %493 = vrot.lane.b32.xlu0 %v491_v42, %s1580_s26 }
 0x579   : > { %v494_v43 = vpop.permute.xlu0 %493 }
 0x57a   : > { %497 = vst.msk [vmem:[%s496_s6] sm:$0x3] %vm267_vm0, %v494_v43  ;;  %1403 = vmatmul.mubr.msk.f32.vlgmr.msra.gmra.mxu0 %vm281_vm2, %v494_v43  ;;  %s1031_s6 = scalar_lea.vmem %s1697_s29, %s1321_s4 }
 0x57b   : > { %1417 = vmatpush3.msra.mxu0 %v1635_v1  ;;  %1424 = vmatprep.mubr.msk.f32.mxu0 %vm1578_vm1, %v1577_v0 }
 0x57c   : > { %1418 = vmatprep.subr.mxu0 %v1577_v0 }
 0x57d   : > { %1419 = vmatpush3.msra.mxu0 %v1637_v2 }
 0x57e   : > { %1420 = vmatprep.subr.mxu0 %v1577_v0 }
 0x57f   : > { %1421 = vmatpush3.msra.mxu0 %v1642_v3 }
 0x580   : > { %1422 = vmatprep.subr.mxu0 %v1577_v0 }
 0x581   : > { %1423 = vmatpush3.msra.mxu0 %v1648_v4 }
 0x582   : > { %1438 = vmatprep.subr.mxu0 %v1577_v0 }
 0x63a   : > { %v570_v45 = vpop.f32.mrf.mxu0 }
 0x63b   : > { %v574_v46 = vadd.f32 %v570_v45, %v501_v44 }
 0x63c   : > { %v1404_v47 = vpop.f32.mrf.mxu0 }
 0x63d   : > { %1505 = vtanh.f32 %v574_v46  ;;  %v1311_v49 = vmul.f32 -1.442695, %v574_v46 }
 0x63f   : > { %1507 = vpow2.f32 %v1311_v49 }
 0x64a   : > { %v1506_v48 = vpop.eup %1505 }
 0x64b   : > { %584 = vrot.lane.b32.xlu1 %v1506_v48, %s1579_s25 }
 0x64c   : > { %v1508_v50 = vpop.eup %1507 }
 0x64d   : > { %v578_v51 = vadd.f32 1.0, %v1508_v50 }
 0x64f   : > { %1509 = vrcp.f32 %v578_v51 }
 0x65c   : > { %v1510_v52 = vpop.eup %1509 }
 0x65d   : > { %v582_v55 = vmul.f32 %v1510_v52, %v485_v39 }
 0x6bd   : > { %v585_v53 = vpop.permute.xlu1 %584 }
 0x6be   : > { %v587_v54 = vmul.f32 %v1510_v52, %v585_v53 }
 0x6c0   : > { %589 = vrot.lane.b32.xlu0 %v587_v54, %s1580_s26 }
 0x732   : > { %v590_v56 = vpop.permute.xlu0 %589 }
 0x733   : > { %v592_v57 = vadd.f32 %v590_v56, %v582_v55 }
 0x735   : > { %1511 = vtanh.f32 %v592_v57 }
 0x742   : > { %v1512_v58 = vpop.eup %1511 }
 0x743   : > { %595 = vrot.lane.b32.xlu1 %v1512_v58, %s1579_s25 }
 0x7b5   : > { %v596_v59 = vpop.permute.xlu1 %595 }
 0x7b6   : > { %v598_v60 = vmul.f32 %v1510_v52, %v596_v59  ;;  %v929_v52 = vld [vmem:[%s928_s5] sm:$0x3] }
 0x7b8   : > { %600 = vrot.lane.b32.xlu0 %v598_v60, %s1580_s26 }
 0x82a   : > { %v601_v61 = vpop.permute.xlu0 %600 }
 0x82b   : > { %604 = vst.msk [vmem:[%s603_s14] sm:$0x3] %vm267_vm0, %v601_v61  ;;  %1414 = vmatmul.mubr.msk.f32.vlgmr.msra.gmra.mxu1 %vm281_vm2, %v601_v61 }
 0x82c   : > { %1428 = vmatpush3.msra.mxu1 %v1635_v1  ;;  %1435 = vmatprep.mubr.msk.f32.mxu1 %vm1578_vm1, %v1577_v0 }
 0x82d   : > { %1429 = vmatprep.subr.mxu1 %v1577_v0 }
 0x82e   : > { %1430 = vmatpush3.msra.mxu1 %v1637_v2 }
 0x82f   : > { %1431 = vmatprep.subr.mxu1 %v1577_v0 }
 0x830   : > { %1432 = vmatpush3.msra.mxu1 %v1642_v3 }
 0x831   : > { %1433 = vmatprep.subr.mxu1 %v1577_v0 }
 0x832   : > { %1434 = vmatpush3.msra.mxu1 %v1648_v4 }
 0x833   : > { %1449 = vmatprep.subr.mxu1 %v1577_v0 }
 0x8eb   : > { %v677_v63 = vpop.f32.mrf.mxu1 }
 0x8ec   : > { %v681_v5 = vadd.f32 %v677_v63, %v608_v62 }
 0x8ed   : > { %v1415_v6 = vpop.f32.mrf.mxu1 }
 0x8ee   : > { %1513 = vtanh.f32 %v681_v5  ;;  %v1314_v8 = vmul.f32 -1.442695, %v681_v5 }
 0x8f0   : > { %1515 = vpow2.f32 %v1314_v8 }
 0x8fb   : > { %v1514_v7 = vpop.eup %1513 }
 0x8fc   : > { %691 = vrot.lane.b32.xlu1 %v1514_v7, %s1579_s25 }
 0x8fd   : > { %v1516_v9 = vpop.eup %1515 }
 0x8fe   : > { %v685_v10 = vadd.f32 1.0, %v1516_v9 }
 0x900   : > { %1517 = vrcp.f32 %v685_v10 }
 0x90d   : > { %v1518_v11 = vpop.eup %1517 }
 0x90e   : > { %v689_v14 = vmul.f32 %v1518_v11, %v592_v57 }
 0x96e   : > { %v692_v12 = vpop.permute.xlu1 %691 }
 0x96f   : > { %v694_v13 = vmul.f32 %v1518_v11, %v692_v12 }
 0x971   : > { %696 = vrot.lane.b32.xlu0 %v694_v13, %s1580_s26 }
 0x9e3   : > { %v697_v15 = vpop.permute.xlu0 %696 }
 0x9e4   : > { %v699_v16 = vadd.f32 %v697_v15, %v689_v14 }
 0x9e6   : > { %1519 = vtanh.f32 %v699_v16 }
 0x9f3   : > { %v1520_v17 = vpop.eup %1519 }
 0x9f4   : > { %702 = vrot.lane.b32.xlu1 %v1520_v17, %s1579_s25 }
 0xa66   : > { %v703_v18 = vpop.permute.xlu1 %702 }
 0xa67   : > { %v705_v19 = vmul.f32 %v1518_v11, %v703_v18  ;;  %v1036_v11 = vld [vmem:[%s1035_s13] sm:$0x3] }
 0xa69   : > { %707 = vrot.lane.b32.xlu0 %v705_v19, %s1580_s26 }
 0xadb   : > { %v708_v20 = vpop.permute.xlu0 %707 }
 0xadc   : > { %711 = vst.msk [vmem:[%s710_s18] sm:$0x3] %vm267_vm0, %v708_v20  ;;  %1425 = vmatmul.mubr.msk.f32.vlgmr.msra.gmra.mxu0 %vm281_vm2, %v708_v20 }
 0xadd   : > { %1439 = vmatpush3.msra.mxu0 %v1635_v1  ;;  %1446 = vmatprep.mubr.msk.f32.mxu0 %vm1578_vm1, %v1577_v0 }
 0xade   : > { %1440 = vmatprep.subr.mxu0 %v1577_v0 }
 0xadf   : > { %1441 = vmatpush3.msra.mxu0 %v1637_v2 }
 0xae0   : > { %1442 = vmatprep.subr.mxu0 %v1577_v0 }
 0xae1   : > { %1443 = vmatpush3.msra.mxu0 %v1642_v3 }
 0xae2   : > { %1444 = vmatprep.subr.mxu0 %v1577_v0 }
 0xae3   : > { %1445 = vmatpush3.msra.mxu0 %v1648_v4 }
 0xb9c   : > { %v784_v22 = vpop.f32.mrf.mxu0 }
 0xb9d   : > { %v788_v23 = vadd.f32 %v784_v22, %v715_v21 }
 0xb9e   : > { %v1426_v24 = vpop.f32.mrf.mxu0 }
 0xb9f   : > { %1521 = vtanh.f32 %v788_v23  ;;  %v1317_v26 = vmul.f32 -1.442695, %v788_v23 }
 0xba1   : > { %1523 = vpow2.f32 %v1317_v26 }
 0xbac   : > { %v1522_v25 = vpop.eup %1521 }
 0xbad   : > { %798 = vrot.lane.b32.xlu1 %v1522_v25, %s1579_s25 }
 0xbae   : > { %v1524_v27 = vpop.eup %1523 }
 0xbaf   : > { %v792_v28 = vadd.f32 1.0, %v1524_v27 }
 0xbb1   : > { %1525 = vrcp.f32 %v792_v28 }
 0xbbe   : > { %v1526_v29 = vpop.eup %1525 }
 0xbbf   : > { %v796_v32 = vmul.f32 %v1526_v29, %v699_v16 }
 0xc1f   : > { %v799_v30 = vpop.permute.xlu1 %798 }
 0xc20   : > { %v801_v31 = vmul.f32 %v1526_v29, %v799_v30 }
 0xc22   : > { %803 = vrot.lane.b32.xlu0 %v801_v31, %s1580_s26 }
 0xc94   : > { %v804_v33 = vpop.permute.xlu0 %803 }
 0xc95   : > { %v806_v34 = vadd.f32 %v804_v33, %v796_v32 }
 0xc97   : > { %1527 = vtanh.f32 %v806_v34 }
 0xca4   : > { %v1528_v35 = vpop.eup %1527 }
 0xca5   : > { %809 = vrot.lane.b32.xlu1 %v1528_v35, %s1579_s25 }
 0xd17   : > { %v810_v36 = vpop.permute.xlu1 %809 }
 0xd18   : > { %v812_v37 = vmul.f32 %v1526_v29, %v810_v36 }
 0xd1a   : > { %814 = vrot.lane.b32.xlu0 %v812_v37, %s1580_s26 }
 0xd8c   : > { %v815_v38 = vpop.permute.xlu0 %814 }
 0xd8d   : > { %818 = vst.msk [vmem:[%s817_s23] sm:$0x3] %vm267_vm0, %v815_v38  ;;  %1436 = vmatmul.mubr.msk.f32.vlgmr.msra.gmra.mxu1 %vm281_vm2, %v815_v38 }
 0xd8e   : > { %1450 = vmatpush3.msra.mxu1 %v1635_v1  ;;  %1457 = vmatprep.mubr.msk.f32.mxu1 %vm1578_vm1, %v1577_v0  ;;  %v822_v1 = vld [vmem:[%s821_s28] sm:$0x3] }
 0xd8f   : > { %1451 = vmatprep.subr.mxu1 %v1577_v0 }
 0xd90   : > { %1452 = vmatpush3.msra.mxu1 %v1637_v2 }
 0xd91   : > { %1453 = vmatprep.subr.mxu1 %v1577_v0 }
 0xd92   : > { %1454 = vmatpush3.msra.mxu1 %v1642_v3 }
 0xd93   : > { %1455 = vmatprep.subr.mxu1 %v1577_v0 }
 0xd94   : > { %1456 = vmatpush3.msra.mxu1 %v1648_v4 }
 0xe4d   : > { %v891_v39 = vpop.f32.mrf.mxu1 }
 0xe4e   : > { %v895_v40 = vadd.f32 %v891_v39, %v822_v1 }
 0xe4f   : > { %v1437_v41 = vpop.f32.mrf.mxu1 }
 0xe50   : > { %1529 = vtanh.f32 %v895_v40  ;;  %v1320_v42 = vmul.f32 -1.442695, %v895_v40 }
 0xe52   : > { %1531 = vpow2.f32 %v1320_v42 }
 0xe5d   : > { %v1530_v2 = vpop.eup %1529 }
 0xe5e   : > { %905 = vrot.lane.b32.xlu1 %v1530_v2, %s1579_s25 }
 0xe5f   : > { %v1532_v3 = vpop.eup %1531 }
 0xe60   : > { %v899_v0 = vadd.f32 1.0, %v1532_v3 }
 0xe62   : > { %1533 = vrcp.f32 %v899_v0 }
 0xe6f   : > { %v1534_v4 = vpop.eup %1533 }
 0xe70   : > { %v903_v45 = vmul.f32 %v1534_v4, %v806_v34 }
 0xed0   : > { %v906_v43 = vpop.permute.xlu1 %905 }
 0xed1   : > { %v908_v44 = vmul.f32 %v1534_v4, %v906_v43 }
 0xed3   : > { %910 = vrot.lane.b32.xlu0 %v908_v44, %s1580_s26 }
 0xf45   : > { %v911_v46 = vpop.permute.xlu0 %910 }
 0xf46   : > { %v913_v47 = vadd.f32 %v911_v46, %v903_v45 }
 0xf48   : > { %1535 = vtanh.f32 %v913_v47 }
 0xf55   : > { %v1536_v48 = vpop.eup %1535 }
 0xf56   : > { %916 = vrot.lane.b32.xlu1 %v1536_v48, %s1579_s25 }
 0xfc8   : > { %v917_v49 = vpop.permute.xlu1 %916 }
 0xfc9   : > { %v919_v50 = vmul.f32 %v1534_v4, %v917_v49 }
 0xfcb   : > { %921 = vrot.lane.b32.xlu0 %v919_v50, %s1580_s26 }
0x103d   : > { %v922_v51 = vpop.permute.xlu0 %921 }
0x103e   : > { %925 = vst.msk [vmem:[%s924_s30] sm:$0x3] %vm267_vm0, %v922_v51  ;;  %1447 = vmatmul.mubr.msk.f32.vlgmr.msra.gmra.mxu0 %vm281_vm2, %v922_v51 }
0x10fe   : > { %v998_v53 = vpop.f32.mrf.mxu0 }
0x10ff   : > { %v1002_v54 = vadd.f32 %v998_v53, %v929_v52 }
0x1100   : > { %v1448_v55 = vpop.f32.mrf.mxu0 }
0x1101   : > { %1537 = vtanh.f32 %v1002_v54  ;;  %v1323_v57 = vmul.f32 -1.442695, %v1002_v54 }
0x1103   : > { %1539 = vpow2.f32 %v1323_v57 }
0x110e   : > { %v1538_v56 = vpop.eup %1537 }
0x110f   : > { %1012 = vrot.lane.b32.xlu1 %v1538_v56, %s1579_s25 }
0x1110   : > { %v1540_v58 = vpop.eup %1539 }
0x1111   : > { %v1006_v59 = vadd.f32 1.0, %v1540_v58 }
0x1113   : > { %1541 = vrcp.f32 %v1006_v59 }
0x1120   : > { %v1542_v60 = vpop.eup %1541 }
0x1121   : > { %v1010_v63 = vmul.f32 %v1542_v60, %v913_v47 }
0x1181   : > { %v1013_v61 = vpop.permute.xlu1 %1012 }
0x1182   : > { %v1015_v62 = vmul.f32 %v1542_v60, %v1013_v61 }
0x1184   : > { %1017 = vrot.lane.b32.xlu0 %v1015_v62, %s1580_s26 }
0x11f6   : > { %v1018_v5 = vpop.permute.xlu0 %1017 }
0x11f7   : > { %v1020_v6 = vadd.f32 %v1018_v5, %v1010_v63 }
0x11f9   : > { %1543 = vtanh.f32 %v1020_v6 }
0x1206   : > { %v1544_v7 = vpop.eup %1543 }
0x1207   : > { %1023 = vrot.lane.b32.xlu1 %v1544_v7, %s1579_s25 }
0x1279   : > { %v1024_v8 = vpop.permute.xlu1 %1023 }
0x127a   : > { %v1026_v9 = vmul.f32 %v1542_v60, %v1024_v8 }
0x127c   : > { %1028 = vrot.lane.b32.xlu0 %v1026_v9, %s1580_s26 }
0x12ee   : > { %v1029_v10 = vpop.permute.xlu0 %1028 }
0x12ef   : > { %1032 = vst.msk [vmem:[%s1031_s6] sm:$0x3] %vm267_vm0, %v1029_v10  ;;  %1458 = vmatmul.mubr.msk.f32.vlgmr.msra.gmra.mxu1 %vm281_vm2, %v1029_v10 }
0x13af   : > { %v1105_v12 = vpop.f32.mrf.mxu1 }
0x13b0   : > { %v1109_v13 = vadd.f32 %v1105_v12, %v1036_v11 }
0x13b1   : > { %v1459_v14 = vpop.f32.mrf.mxu1 }
0x13b2   : > { %1545 = vtanh.f32 %v1109_v13  ;;  %v1326_v16 = vmul.f32 -1.442695, %v1109_v13 }
0x13b4   : > { %1547 = vpow2.f32 %v1326_v16 }
0x13bf   : > { %v1546_v15 = vpop.eup %1545 }
0x13c0   : > { %1119 = vrot.lane.b32.xlu1 %v1546_v15, %s1579_s25 }
0x13c1   : > { %v1548_v17 = vpop.eup %1547 }
0x13c2   : > { %v1113_v18 = vadd.f32 1.0, %v1548_v17 }
0x13c4   : > { %1549 = vrcp.f32 %v1113_v18 }
0x13d1   : > { %v1550_v19 = vpop.eup %1549 }
0x13d2   : > { %v1117_v22 = vmul.f32 %v1550_v19, %v1020_v6 }
0x1432   : > { %v1120_v20 = vpop.permute.xlu1 %1119 }
0x1433   : > { %v1122_v21 = vmul.f32 %v1550_v19, %v1120_v20 }
0x1435   : > { %1124 = vrot.lane.b32.xlu0 %v1122_v21, %s1580_s26 }
0x14a7   : > { %v1125_v23 = vpop.permute.xlu0 %1124 }
0x14a8   : > { %v1127_v24 = vadd.f32 %v1125_v23, %v1117_v22 }
0x14aa   : > { %1551 = vtanh.f32 %v1127_v24 }
0x14b7   : > { %v1552_v25 = vpop.eup %1551 }
0x14b8   : > { %1130 = vrot.lane.b32.xlu1 %v1552_v25, %s1579_s25 }
0x14bc   : > { %1142 = vrot.lane.b32.xlu1 %v1127_v24, %s1581_s9 }
0x152a   : > { %v1131_v26 = vpop.permute.xlu1 %1130 }
0x152b   : > { %v1133_v27 = vmul.f32 %v1550_v19, %v1131_v26 }
0x152d   : > { %1135 = vrot.lane.b32.xlu0 %v1133_v27, %s1580_s26 }
0x152e   : > { %v1143_v28 = vpop.permute.xlu1 %1142 }
0x152f   : > { %1145 = vst.msk [vmem:[#allocation3] sm:$0x3] %vm267_vm0, %v1143_v28 }
0x159f   : > { %v1136_v29 = vpop.permute.xlu0 %1135 }
0x15a0   : > { %1139 = vst.msk [vmem:[%s1138_s22] sm:$0x3] %vm267_vm0, %v1136_v29  ;;  %1140 = vst.msk [vmem:[#allocation2] sm:$0x3] %vm267_vm0, %v1136_v29 }
0x15a1 PF: > { %s12_s11 = sadd.s32 1, %s1575_s11   ;;  %s1860_s9 = smov %s1571_s10 }
0x15a2   : > { %p9_p6 = scmp.ge.s32.totalorder %s12_s11, 4   ;;  %s1861_s10 = smov %s1863_s12 }
0x15a4   :  { %11 = sbr.rel (!%p9_p6) target bundleno = 2 (0x2), region = 81 }

</bundles_post_ra>
